<compile_context>
chip_gen: v7x
topology: tpu7x:2x2x1
jax: 0.10.0
libtpu: 0.0.40
codegen_flags: <defaults>
</compile_context>

<pallas_src>
import numpy as np
import jax
import jax.numpy as jnp
from jax import lax
from jax.experimental import pallas as pl
from jax.experimental.pallas import tpu as pltpu


def _tpu_hints():
    """Return (vmem_capacity_bytes, multi_tensorcore) with safe fallbacks."""
    vmem_cap = 128 << 20
    multi_tc = False
    try:
        info = pltpu.get_tpu_info()
        vmem_cap = int(getattr(info, "vmem_capacity_bytes", vmem_cap))
    except Exception:
        pass
    try:
        kind = jax.devices()[0].device_kind.lower()
        multi_tc = "v7" in kind          # v7x: 2 TensorCores share the grid
    except Exception:
        pass
    return vmem_cap, multi_tc


def _largest_divisor_leq(n, cap):
    cap = max(1, min(int(cap), int(n)))
    for d in range(cap, 0, -1):
        if n % d == 0:
            return d
    return 1


def _make_overlay_kernel(*, nb, na, blk, w):
    """Per-expert prompt assembly over one (blk, W, D) class-block window."""

    def kernel(*refs):
        i = 0
        buf_ref = refs[i]; i += 1            # (blk, W, D) window (aliased w/ out)
        nl_ref = refs[i]; i += 1             # (n_cls,) int32 in SMEM
        ctx_b_ref = None
        ctx_a_ref = None
        if nb > 0:
            ctx_b_ref = refs[i]; i += 1      # (nb, D) learned prefix ctx
        if na > 0:
            ctx_a_ref = refs[i]; i += 1      # (na, D) learned suffix ctx
        out_ref = refs[i]                    # (blk, W, D) window of the output

        c0 = pl.program_id(0) * blk
        seq = lax.broadcasted_iota(jnp.int32, (w, 1), 0)            # (W, 1)

        # Hoisted loop invariants (no per-iteration broadcasts / reloads).
        ctx_b_rows = [ctx_b_ref[k:k + 1, :] for k in range(nb)]     # (1, D) each
        ctx_a_rows = [ctx_a_ref[k:k + 1, :] for k in range(na)]     # (1, D) each
        b_masks = [seq == (1 + k) for k in range(nb)]                # static rows

        def body(j, carry):
            row = buf_ref[j]                                         # (W, D)
            # ctx_before: identical static rows 1..1+nb for every class.
            for k in range(nb):
                row = jnp.where(b_masks[k], ctx_b_rows[k], row)
            # ctx_after: follows the class name; position from SMEM name_lens.
            # A start outside [0, W) can never write out of bounds here — the
            # equality masks simply never fire (init-time assert guarantees it
            # never happens for valid inputs).
            if na > 0:
                start = 1 + nb + nl_ref[c0 + j]
                for k in range(na):
                    row = jnp.where(seq == start + k, ctx_a_rows[k], row)
            out_ref[j] = row                       # full lane-dense row store
            return carry

        unroll = next(u for u in (8, 4, 2, 1) if blk % u == 0)
        lax.fori_loop(0, blk, body, None, unroll=unroll)

    return kernel


def construct_prompts_pallas(buf, ctx_before, ctx_after, name_lens, *,
                             max_name_len, class_block=None):
    """Assemble one expert's (n_cls, L, D) prompt embeddings in place.

    `buf` holds the current prompt tensor (the static skeleton on the first
    call); it is aliased to the output, so only the mutable seq window is
    read/written and the EOS/pad tail stays untouched in HBM.
    """
    n_cls, L, D = buf.shape
    nb = int(ctx_before.shape[0])
    na = int(ctx_after.shape[0])
    dtype = buf.dtype
    itemsize = int(jnp.dtype(dtype).itemsize)

    # Mutable seq window [0, 1+nb+max_name_len+na), rounded up to the native
    # sublane tile for this dtype (8 rows of 32-bit packing).
    sub = 8 * max(1, 4 // itemsize)           # f32 -> 8, bf16 -> 16, fp8 -> 32
    w = 1 + nb + max_name_len + na
    w = min(L, ((w + sub - 1) // sub) * sub)
    per_class_bytes = w * D * itemsize

    # ---- generation-aware block sizing --------------------------------------
    vmem_cap, multi_tc = _tpu_hints()
    vmem_budget = min(40 << 20, vmem_cap // 2)              # leave headroom
    target_bytes = 8 << 20 if multi_tc else 4 << 20
    target_bytes = min(target_bytes,
                       max(per_class_bytes, (vmem_budget - (2 << 20)) // 4))
    cap = max(1, target_bytes // per_class_bytes)
    if multi_tc and n_cls >= 2:
        cap = min(cap, n_cls // 2)            # >=2 blocks so both TCs get work
    if class_block is not None:
        cap = min(cap, int(class_block))
    blk = _largest_divisor_leq(n_cls, cap)    # exact divisor: no ragged block
    num_blocks = n_cls // blk
    blk_bytes = blk * per_class_bytes
    vmem_limit = int(min(max(4 * blk_bytes + (2 << 20), 8 << 20),
                         int(vmem_cap * 0.9)))

    # ---- specs / operands ----------------------------------------------------
    in_specs = [pl.BlockSpec((blk, w, D), lambda c: (c, 0, 0)),
                pl.BlockSpec(memory_space=pltpu.MemorySpace.SMEM)]
    operands = [buf, jnp.asarray(name_lens, jnp.int32)]
    if nb > 0:
        in_specs.append(pl.BlockSpec((nb, D), lambda c: (0, 0)))
        operands.append(ctx_before)
    if na > 0:
        in_specs.append(pl.BlockSpec((na, D), lambda c: (0, 0)))
        operands.append(ctx_after)

    kernel = _make_overlay_kernel(nb=nb, na=na, blk=blk, w=w)
    bytes_accessed = int(2 * n_cls * w * D * itemsize
                         + (nb + na) * D * itemsize + n_cls * 4)

    return pl.pallas_call(
        kernel,
        grid=(num_blocks,),
        in_specs=in_specs,
        out_specs=pl.BlockSpec((blk, w, D), lambda c: (c, 0, 0)),
        out_shape=jax.ShapeDtypeStruct((n_cls, L, D), dtype),
        input_output_aliases={0: 0},          # buf (operand 0) -> output 0
        compiler_params=pltpu.CompilerParams(
            dimension_semantics=("parallel",),
            vmem_limit_bytes=vmem_limit),
        cost_estimate=pl.CostEstimate(flops=0, transcendentals=0,
                                      bytes_accessed=bytes_accessed),
    )(*operands)


class PromptLearnerPallas:
    """Synthetic PromptLearner (MoCoOp) with a Pallas forward pass.

    The gate Linear(vis_dim, num_experts), the optional correction vector `w`,
    CLIP tokenisation / token_embedding and the frozen text-encoder reference
    features are not used by forward() and are omitted (host-side / unrelated).
    """

    def __init__(self, key, *, n_cls, ctx_dim, seq_len, templates, name_lens,
                 dtype=jnp.bfloat16, class_block=None):
        self.num_experts = len(templates)
        self.n_ctx_before = [int(t[0]) for t in templates]
        self.n_ctx_after = [int(t[1]) for t in templates]
        self.n_cls = n_cls
        self.ctx_dim = ctx_dim
        self.seq_len = seq_len
        self.dtype = dtype
        self.class_block = class_block
        self.name_lens_py = [int(x) for x in name_lens]
        self.max_name_len = max(self.name_lens_py)
        self.name_lens = jnp.asarray(self.name_lens_py, jnp.int32)

        self.token_prefix = []   # per expert: (n_cls, 1, D)   buffer
        self.token_suffix = []   # per expert: (n_cls, Ls, D)  buffer
        self.ctx_before = []     # per expert: (nb, D)         parameter
        self.ctx_after = []      # per expert: (na, D)         parameter
        self.prompt_bufs = []    # per expert: (n_cls, L, D)   persistent, aliased

        for nb, na in zip(self.n_ctx_before, self.n_ctx_after):
            Ls = seq_len - 1 - nb
            assert self.max_name_len + na <= Ls, "prompt does not fit in seq_len"
            key, k1, k2, k3, k4 = jax.random.split(key, 5)
            prefix = (jax.random.normal(k1, (n_cls, 1, ctx_dim), jnp.float32)
                      * 0.02).astype(dtype)
            suffix = (jax.random.normal(k2, (n_cls, Ls, ctx_dim), jnp.float32)
                      * 0.02).astype(dtype)
            ctx_b = (jax.random.normal(k3, (nb, ctx_dim), jnp.float32)
                     * 0.02).astype(dtype)
            ctx_a = (jax.random.normal(k4, (na, ctx_dim), jnp.float32)
                     * 0.02).astype(dtype)
            self.token_prefix.append(prefix)
            self.token_suffix.append(suffix)
            self.ctx_before.append(ctx_b)
            self.ctx_after.append(ctx_a)
            # Static skeleton [SOS | zeros(nb) | suffix]. Overwritten in place
            # by the aliased kernel — only ever at the same rows per class.
            self.prompt_bufs.append(jnp.concatenate(
                [prefix, jnp.zeros((n_cls, nb, ctx_dim), dtype), suffix],
                axis=1))

        def _forward_impl(bufs, ctx_b_all, ctx_a_all, name_lens):
            outs = []
            for i in range(self.num_experts):
                outs.append(construct_prompts_pallas(
                    bufs[i], ctx_b_all[i], ctx_a_all[i], name_lens,
                    max_name_len=self.max_name_len,
                    class_block=self.class_block))
            return tuple(outs)

        # One jit around all expert launches; the prompt buffers are donated
        # so the pallas input_output_aliases become true in-place updates.
        self._forward_jit = jax.jit(_forward_impl, donate_argnums=(0,))

    def forward(self):
        outs = self._forward_jit(tuple(self.prompt_bufs),
                                 tuple(self.ctx_before),
                                 tuple(self.ctx_after),
                                 self.name_lens)
        outs = list(outs)
        # Outputs alias the persistent buffers; the next forward donates them
        # again — callers must copy if they need them across calls.
        self.prompt_bufs = outs
        return outs


def _reference_construct(prefix, suffix, ctx_before, ctx_after, name_lens):
    """Pure-numpy reference of PromptLearner.construct_prompts."""
    to_np = lambda x: np.asarray(jnp.asarray(x, jnp.float32))
    prefix, suffix = to_np(prefix), to_np(suffix)
    ctx_before, ctx_after = to_np(ctx_before), to_np(ctx_after)
    na = ctx_after.shape[0]
    outs = []
    for i in range(prefix.shape[0]):
        nl = int(name_lens[i])
        parts = [prefix[i]]                      # (1, D)
        if ctx_before.shape[0] > 0:
            parts.append(ctx_before)             # (nb, D)
        parts.append(suffix[i, :nl])             # class-name tokens
        if na > 0:
            parts.append(ctx_after)              # (na, D)
        parts.append(suffix[i, nl + na:])        # EOS + padding
        outs.append(np.concatenate(parts, axis=0))
    return np.stack(outs, axis=0)


if __name__ == "__main__":
    key = jax.random.PRNGKey(0)

    n_cls = 8
    ctx_dim = 128      # lane-aligned embedding width (512 in real CLIP)
    seq_len = 32       # 77 in real CLIP; > mutable window so the aliased
                       # (untouched) EOS/pad tail path is actually exercised
    # expert 0: "a photo of a {}"   -> 4 ctx tokens before, 0 after
    # expert 1: "a {} in the scene" -> 1 ctx token  before, 3 after
    templates = [(4, 0), (1, 3)]
    name_lens = [1, 2, 3, 4, 1, 2, 3, 4]

    learner = PromptLearnerPallas(
        key, n_cls=n_cls, ctx_dim=ctx_dim, seq_len=seq_len,
        templates=templates, name_lens=name_lens, dtype=jnp.bfloat16)

    refs = [_reference_construct(
                learner.token_prefix[i], learner.token_suffix[i],
                learner.ctx_before[i], learner.ctx_after[i], name_lens)
            for i in range(learner.num_experts)]

    ok = True
    # Run twice: the second call exercises the steady-state in-place
    # (aliased + donated) buffer update.
    for _ in range(2):
        prompts = learner.forward()
        prompts = [jax.block_until_ready(p) for p in prompts]
        got = [np.asarray(jnp.asarray(p, jnp.float32)) for p in prompts]
        for i in range(learner.num_experts):
            ok &= (got[i].shape == (n_cls, seq_len, ctx_dim))
            ok &= bool(np.array_equal(got[i], refs[i]))

    print("KERNEL_OK" if ok else "MISMATCH")
</pallas_src>

<mosaic_0001>
module attributes {stable_mosaic.version = 11 : i64} {
  func.func @kernel(%arg0: i32, %arg1: memref<8x16x128xbf16, #tpu.memory_space<vmem>>, %arg2: memref<8xi32, #tpu.memory_space<smem>>, %arg3: memref<4x128xbf16, #tpu.memory_space<vmem>>, %arg4: memref<8x16x128xbf16, #tpu.memory_space<vmem>>) attributes {dimension_semantics = [#tpu.dimension_semantics<parallel>], iteration_bounds = array<i64: 1>, scalar_prefetch = 0 : i64, scratch_operands = 0 : i64, tpu.core_type = #tpu.core_type<tc>, window_params = [{transform_indices = @transform_0, window_bounds = array<i64: 8, 16, 128>}, {transform_indices = @transform_1, window_bounds = array<i64: 8>}, {pipeline_mode = #tpu.pipeline_mode<synchronous>, transform_indices = @transform_2, window_bounds = array<i64: 4, 128>}, {transform_indices = @transform_3, window_bounds = array<i64: 8, 16, 128>}]} {
    %0 = tpu.iota {dimensions = array<i32: 0>} : vector<16x1xi32>
    %c0 = arith.constant 0 : index
    %c0_0 = arith.constant 0 : index
    %1 = vector.load %arg3[%c0, %c0_0] : memref<4x128xbf16, #tpu.memory_space<vmem>>, vector<1x128xbf16>
    %c1 = arith.constant 1 : index
    %c0_1 = arith.constant 0 : index
    %2 = vector.load %arg3[%c1, %c0_1] : memref<4x128xbf16, #tpu.memory_space<vmem>>, vector<1x128xbf16>
    %c2 = arith.constant 2 : index
    %c0_2 = arith.constant 0 : index
    %3 = vector.load %arg3[%c2, %c0_2] : memref<4x128xbf16, #tpu.memory_space<vmem>>, vector<1x128xbf16>
    %c3 = arith.constant 3 : index
    %c0_3 = arith.constant 0 : index
    %4 = vector.load %arg3[%c3, %c0_3] : memref<4x128xbf16, #tpu.memory_space<vmem>>, vector<1x128xbf16>
    %c1_i32 = arith.constant 1 : i32
    %5 = vector.broadcast %c1_i32 : i32 to vector<16x1xi32>
    %6 = arith.cmpi eq, %0, %5 : vector<16x1xi32>
    %c2_i32 = arith.constant 2 : i32
    %7 = vector.broadcast %c2_i32 : i32 to vector<16x1xi32>
    %8 = arith.cmpi eq, %0, %7 : vector<16x1xi32>
    %c3_i32 = arith.constant 3 : i32
    %9 = vector.broadcast %c3_i32 : i32 to vector<16x1xi32>
    %10 = arith.cmpi eq, %0, %9 : vector<16x1xi32>
    %c4_i32 = arith.constant 4 : i32
    %11 = vector.broadcast %c4_i32 : i32 to vector<16x1xi32>
    %12 = arith.cmpi eq, %0, %11 : vector<16x1xi32>
    %c0_i32 = arith.constant 0 : i32
    %13 = arith.index_cast %c0_i32 : i32 to index
    %c0_4 = arith.constant 0 : index
    %c0_5 = arith.constant 0 : index
    %14 = vector.load %arg1[%13, %c0_4, %c0_5] : memref<8x16x128xbf16, #tpu.memory_space<vmem>>, vector<1x16x128xbf16>
    %15 = vector.shape_cast %14 : vector<1x16x128xbf16> to vector<16x128xbf16>
    %16 = vector.shape_cast %6 : vector<16x1xi1> to vector<16x1xi1>
    %17 = vector.broadcast %16 : vector<16x1xi1> to vector<16x128xi1>
    %18 = vector.shape_cast %1 : vector<1x128xbf16> to vector<1x128xbf16>
    %19 = vector.broadcast %18 : vector<1x128xbf16> to vector<16x128xbf16>
    %20 = arith.select %17, %19, %15 : vector<16x128xi1>, vector<16x128xbf16>
    %21 = vector.shape_cast %8 : vector<16x1xi1> to vector<16x1xi1>
    %22 = vector.broadcast %21 : vector<16x1xi1> to vector<16x128xi1>
    %23 = vector.shape_cast %2 : vector<1x128xbf16> to vector<1x128xbf16>
    %24 = vector.broadcast %23 : vector<1x128xbf16> to vector<16x128xbf16>
    %25 = arith.select %22, %24, %20 : vector<16x128xi1>, vector<16x128xbf16>
    %26 = vector.shape_cast %10 : vector<16x1xi1> to vector<16x1xi1>
    %27 = vector.broadcast %26 : vector<16x1xi1> to vector<16x128xi1>
    %28 = vector.shape_cast %3 : vector<1x128xbf16> to vector<1x128xbf16>
    %29 = vector.broadcast %28 : vector<1x128xbf16> to vector<16x128xbf16>
    %30 = arith.select %27, %29, %25 : vector<16x128xi1>, vector<16x128xbf16>
    %31 = vector.shape_cast %12 : vector<16x1xi1> to vector<16x1xi1>
    %32 = vector.broadcast %31 : vector<16x1xi1> to vector<16x128xi1>
    %33 = vector.shape_cast %4 : vector<1x128xbf16> to vector<1x128xbf16>
    %34 = vector.broadcast %33 : vector<1x128xbf16> to vector<16x128xbf16>
    %35 = arith.select %32, %34, %30 : vector<16x128xi1>, vector<16x128xbf16>
    %36 = arith.index_cast %c0_i32 : i32 to index
    %c0_6 = arith.constant 0 : index
    %c0_7 = arith.constant 0 : index
    %37 = vector.load %arg4[%36, %c0_6, %c0_7] : memref<8x16x128xbf16, #tpu.memory_space<vmem>>, vector<1x16x128xbf16>
    %38 = vector.shape_cast %37 : vector<1x16x128xbf16> to vector<16x128xbf16>
    %39 = vector.shape_cast %35 : vector<16x128xbf16> to vector<1x16x128xbf16>
    tpu.vector_store %arg4[%36, %c0_6, %c0_7], %39 {strides = array<i32>} : memref<8x16x128xbf16, #tpu.memory_space<vmem>>, vector<1x16x128xbf16>,
    %c1_i32_8 = arith.constant 1 : i32
    %40 = arith.index_cast %c1_i32_8 : i32 to index
    %c0_9 = arith.constant 0 : index
    %c0_10 = arith.constant 0 : index
    %41 = vector.load %arg1[%40, %c0_9, %c0_10] : memref<8x16x128xbf16, #tpu.memory_space<vmem>>, vector<1x16x128xbf16>
    %42 = vector.shape_cast %41 : vector<1x16x128xbf16> to vector<16x128xbf16>
    %43 = vector.shape_cast %6 : vector<16x1xi1> to vector<16x1xi1>
    %44 = vector.broadcast %43 : vector<16x1xi1> to vector<16x128xi1>
    %45 = vector.shape_cast %1 : vector<1x128xbf16> to vector<1x128xbf16>
    %46 = vector.broadcast %45 : vector<1x128xbf16> to vector<16x128xbf16>
    %47 = arith.select %44, %46, %42 : vector<16x128xi1>, vector<16x128xbf16>
    %48 = vector.shape_cast %8 : vector<16x1xi1> to vector<16x1xi1>
    %49 = vector.broadcast %48 : vector<16x1xi1> to vector<16x128xi1>
    %50 = vector.shape_cast %2 : vector<1x128xbf16> to vector<1x128xbf16>
    %51 = vector.broadcast %50 : vector<1x128xbf16> to vector<16x128xbf16>
    %52 = arith.select %49, %51, %47 : vector<16x128xi1>, vector<16x128xbf16>
    %53 = vector.shape_cast %10 : vector<16x1xi1> to vector<16x1xi1>
    %54 = vector.broadcast %53 : vector<16x1xi1> to vector<16x128xi1>
    %55 = vector.shape_cast %3 : vector<1x128xbf16> to vector<1x128xbf16>
    %56 = vector.broadcast %55 : vector<1x128xbf16> to vector<16x128xbf16>
    %57 = arith.select %54, %56, %52 : vector<16x128xi1>, vector<16x128xbf16>
    %58 = vector.shape_cast %12 : vector<16x1xi1> to vector<16x1xi1>
    %59 = vector.broadcast %58 : vector<16x1xi1> to vector<16x128xi1>
    %60 = vector.shape_cast %4 : vector<1x128xbf16> to vector<1x128xbf16>
    %61 = vector.broadcast %60 : vector<1x128xbf16> to vector<16x128xbf16>
    %62 = arith.select %59, %61, %57 : vector<16x128xi1>, vector<16x128xbf16>
    %63 = arith.index_cast %c1_i32_8 : i32 to index
    %c0_11 = arith.constant 0 : index
    %c0_12 = arith.constant 0 : index
    %64 = vector.load %arg4[%63, %c0_11, %c0_12] : memref<8x16x128xbf16, #tpu.memory_space<vmem>>, vector<1x16x128xbf16>
    %65 = vector.shape_cast %64 : vector<1x16x128xbf16> to vector<16x128xbf16>
    %66 = vector.shape_cast %62 : vector<16x128xbf16> to vector<1x16x128xbf16>
    tpu.vector_store %arg4[%63, %c0_11, %c0_12], %66 {strides = array<i32>} : memref<8x16x128xbf16, #tpu.memory_space<vmem>>, vector<1x16x128xbf16>,
    %c2_i32_13 = arith.constant 2 : i32
    %67 = arith.index_cast %c2_i32_13 : i32 to index
    %c0_14 = arith.constant 0 : index
    %c0_15 = arith.constant 0 : index
    %68 = vector.load %arg1[%67, %c0_14, %c0_15] : memref<8x16x128xbf16, #tpu.memory_space<vmem>>, vector<1x16x128xbf16>
    %69 = vector.shape_cast %68 : vector<1x16x128xbf16> to vector<16x128xbf16>
    %70 = vector.shape_cast %6 : vector<16x1xi1> to vector<16x1xi1>
    %71 = vector.broadcast %70 : vector<16x1xi1> to vector<16x128xi1>
    %72 = vector.shape_cast %1 : vector<1x128xbf16> to vector<1x128xbf16>
    %73 = vector.broadcast %72 : vector<1x128xbf16> to vector<16x128xbf16>
    %74 = arith.select %71, %73, %69 : vector<16x128xi1>, vector<16x128xbf16>
    %75 = vector.shape_cast %8 : vector<16x1xi1> to vector<16x1xi1>
    %76 = vector.broadcast %75 : vector<16x1xi1> to vector<16x128xi1>
    %77 = vector.shape_cast %2 : vector<1x128xbf16> to vector<1x128xbf16>
    %78 = vector.broadcast %77 : vector<1x128xbf16> to vector<16x128xbf16>
    %79 = arith.select %76, %78, %74 : vector<16x128xi1>, vector<16x128xbf16>
    %80 = vector.shape_cast %10 : vector<16x1xi1> to vector<16x1xi1>
    %81 = vector.broadcast %80 : vector<16x1xi1> to vector<16x128xi1>
    %82 = vector.shape_cast %3 : vector<1x128xbf16> to vector<1x128xbf16>
    %83 = vector.broadcast %82 : vector<1x128xbf16> to vector<16x128xbf16>
    %84 = arith.select %81, %83, %79 : vector<16x128xi1>, vector<16x128xbf16>
    %85 = vector.shape_cast %12 : vector<16x1xi1> to vector<16x1xi1>
    %86 = vector.broadcast %85 : vector<16x1xi1> to vector<16x128xi1>
    %87 = vector.shape_cast %4 : vector<1x128xbf16> to vector<1x128xbf16>
    %88 = vector.broadcast %87 : vector<1x128xbf16> to vector<16x128xbf16>
    %89 = arith.select %86, %88, %84 : vector<16x128xi1>, vector<16x128xbf16>
    %90 = arith.index_cast %c2_i32_13 : i32 to index
    %c0_16 = arith.constant 0 : index
    %c0_17 = arith.constant 0 : index
    %91 = vector.load %arg4[%90, %c0_16, %c0_17] : memref<8x16x128xbf16, #tpu.memory_space<vmem>>, vector<1x16x128xbf16>
    %92 = vector.shape_cast %91 : vector<1x16x128xbf16> to vector<16x128xbf16>
    %93 = vector.shape_cast %89 : vector<16x128xbf16> to vector<1x16x128xbf16>
    tpu.vector_store %arg4[%90, %c0_16, %c0_17], %93 {strides = array<i32>} : memref<8x16x128xbf16, #tpu.memory_space<vmem>>, vector<1x16x128xbf16>,
    %c3_i32_18 = arith.constant 3 : i32
    %94 = arith.index_cast %c3_i32_18 : i32 to index
    %c0_19 = arith.constant 0 : index
    %c0_20 = arith.constant 0 : index
    %95 = vector.load %arg1[%94, %c0_19, %c0_20] : memref<8x16x128xbf16, #tpu.memory_space<vmem>>, vector<1x16x128xbf16>
    %96 = vector.shape_cast %95 : vector<1x16x128xbf16> to vector<16x128xbf16>
    %97 = vector.shape_cast %6 : vector<16x1xi1> to vector<16x1xi1>
    %98 = vector.broadcast %97 : vector<16x1xi1> to vector<16x128xi1>
    %99 = vector.shape_cast %1 : vector<1x128xbf16> to vector<1x128xbf16>
    %100 = vector.broadcast %99 : vector<1x128xbf16> to vector<16x128xbf16>
    %101 = arith.select %98, %100, %96 : vector<16x128xi1>, vector<16x128xbf16>
    %102 = vector.shape_cast %8 : vector<16x1xi1> to vector<16x1xi1>
    %103 = vector.broadcast %102 : vector<16x1xi1> to vector<16x128xi1>
    %104 = vector.shape_cast %2 : vector<1x128xbf16> to vector<1x128xbf16>
    %105 = vector.broadcast %104 : vector<1x128xbf16> to vector<16x128xbf16>
    %106 = arith.select %103, %105, %101 : vector<16x128xi1>, vector<16x128xbf16>
    %107 = vector.shape_cast %10 : vector<16x1xi1> to vector<16x1xi1>
    %108 = vector.broadcast %107 : vector<16x1xi1> to vector<16x128xi1>
    %109 = vector.shape_cast %3 : vector<1x128xbf16> to vector<1x128xbf16>
    %110 = vector.broadcast %109 : vector<1x128xbf16> to vector<16x128xbf16>
    %111 = arith.select %108, %110, %106 : vector<16x128xi1>, vector<16x128xbf16>
    %112 = vector.shape_cast %12 : vector<16x1xi1> to vector<16x1xi1>
    %113 = vector.broadcast %112 : vector<16x1xi1> to vector<16x128xi1>
    %114 = vector.shape_cast %4 : vector<1x128xbf16> to vector<1x128xbf16>
    %115 = vector.broadcast %114 : vector<1x128xbf16> to vector<16x128xbf16>
    %116 = arith.select %113, %115, %111 : vector<16x128xi1>, vector<16x128xbf16>
    %117 = arith.index_cast %c3_i32_18 : i32 to index
    %c0_21 = arith.constant 0 : index
    %c0_22 = arith.constant 0 : index
    %118 = vector.load %arg4[%117, %c0_21, %c0_22] : memref<8x16x128xbf16, #tpu.memory_space<vmem>>, vector<1x16x128xbf16>
    %119 = vector.shape_cast %118 : vector<1x16x128xbf16> to vector<16x128xbf16>
    %120 = vector.shape_cast %116 : vector<16x128xbf16> to vector<1x16x128xbf16>
    tpu.vector_store %arg4[%117, %c0_21, %c0_22], %120 {strides = array<i32>} : memref<8x16x128xbf16, #tpu.memory_space<vmem>>, vector<1x16x128xbf16>,
    %c4_i32_23 = arith.constant 4 : i32
    %121 = arith.index_cast %c4_i32_23 : i32 to index
    %c0_24 = arith.constant 0 : index
    %c0_25 = arith.constant 0 : index
    %122 = vector.load %arg1[%121, %c0_24, %c0_25] : memref<8x16x128xbf16, #tpu.memory_space<vmem>>, vector<1x16x128xbf16>
    %123 = vector.shape_cast %122 : vector<1x16x128xbf16> to vector<16x128xbf16>
    %124 = vector.shape_cast %6 : vector<16x1xi1> to vector<16x1xi1>
    %125 = vector.broadcast %124 : vector<16x1xi1> to vector<16x128xi1>
    %126 = vector.shape_cast %1 : vector<1x128xbf16> to vector<1x128xbf16>
    %127 = vector.broadcast %126 : vector<1x128xbf16> to vector<16x128xbf16>
    %128 = arith.select %125, %127, %123 : vector<16x128xi1>, vector<16x128xbf16>
    %129 = vector.shape_cast %8 : vector<16x1xi1> to vector<16x1xi1>
    %130 = vector.broadcast %129 : vector<16x1xi1> to vector<16x128xi1>
    %131 = vector.shape_cast %2 : vector<1x128xbf16> to vector<1x128xbf16>
    %132 = vector.broadcast %131 : vector<1x128xbf16> to vector<16x128xbf16>
    %133 = arith.select %130, %132, %128 : vector<16x128xi1>, vector<16x128xbf16>
    %134 = vector.shape_cast %10 : vector<16x1xi1> to vector<16x1xi1>
    %135 = vector.broadcast %134 : vector<16x1xi1> to vector<16x128xi1>
    %136 = vector.shape_cast %3 : vector<1x128xbf16> to vector<1x128xbf16>
    %137 = vector.broadcast %136 : vector<1x128xbf16> to vector<16x128xbf16>
    %138 = arith.select %135, %137, %133 : vector<16x128xi1>, vector<16x128xbf16>
    %139 = vector.shape_cast %12 : vector<16x1xi1> to vector<16x1xi1>
    %140 = vector.broadcast %139 : vector<16x1xi1> to vector<16x128xi1>
    %141 = vector.shape_cast %4 : vector<1x128xbf16> to vector<1x128xbf16>
    %142 = vector.broadcast %141 : vector<1x128xbf16> to vector<16x128xbf16>
    %143 = arith.select %140, %142, %138 : vector<16x128xi1>, vector<16x128xbf16>
    %144 = arith.index_cast %c4_i32_23 : i32 to index
    %c0_26 = arith.constant 0 : index
    %c0_27 = arith.constant 0 : index
    %145 = vector.load %arg4[%144, %c0_26, %c0_27] : memref<8x16x128xbf16, #tpu.memory_space<vmem>>, vector<1x16x128xbf16>
    %146 = vector.shape_cast %145 : vector<1x16x128xbf16> to vector<16x128xbf16>
    %147 = vector.shape_cast %143 : vector<16x128xbf16> to vector<1x16x128xbf16>
    tpu.vector_store %arg4[%144, %c0_26, %c0_27], %147 {strides = array<i32>} : memref<8x16x128xbf16, #tpu.memory_space<vmem>>, vector<1x16x128xbf16>,
    %c5_i32 = arith.constant 5 : i32
    %148 = arith.index_cast %c5_i32 : i32 to index
    %c0_28 = arith.constant 0 : index
    %c0_29 = arith.constant 0 : index
    %149 = vector.load %arg1[%148, %c0_28, %c0_29] : memref<8x16x128xbf16, #tpu.memory_space<vmem>>, vector<1x16x128xbf16>
    %150 = vector.shape_cast %149 : vector<1x16x128xbf16> to vector<16x128xbf16>
    %151 = vector.shape_cast %6 : vector<16x1xi1> to vector<16x1xi1>
    %152 = vector.broadcast %151 : vector<16x1xi1> to vector<16x128xi1>
    %153 = vector.shape_cast %1 : vector<1x128xbf16> to vector<1x128xbf16>
    %154 = vector.broadcast %153 : vector<1x128xbf16> to vector<16x128xbf16>
    %155 = arith.select %152, %154, %150 : vector<16x128xi1>, vector<16x128xbf16>
    %156 = vector.shape_cast %8 : vector<16x1xi1> to vector<16x1xi1>
    %157 = vector.broadcast %156 : vector<16x1xi1> to vector<16x128xi1>
    %158 = vector.shape_cast %2 : vector<1x128xbf16> to vector<1x128xbf16>
    %159 = vector.broadcast %158 : vector<1x128xbf16> to vector<16x128xbf16>
    %160 = arith.select %157, %159, %155 : vector<16x128xi1>, vector<16x128xbf16>
    %161 = vector.shape_cast %10 : vector<16x1xi1> to vector<16x1xi1>
    %162 = vector.broadcast %161 : vector<16x1xi1> to vector<16x128xi1>
    %163 = vector.shape_cast %3 : vector<1x128xbf16> to vector<1x128xbf16>
    %164 = vector.broadcast %163 : vector<1x128xbf16> to vector<16x128xbf16>
    %165 = arith.select %162, %164, %160 : vector<16x128xi1>, vector<16x128xbf16>
    %166 = vector.shape_cast %12 : vector<16x1xi1> to vector<16x1xi1>
    %167 = vector.broadcast %166 : vector<16x1xi1> to vector<16x128xi1>
    %168 = vector.shape_cast %4 : vector<1x128xbf16> to vector<1x128xbf16>
    %169 = vector.broadcast %168 : vector<1x128xbf16> to vector<16x128xbf16>
    %170 = arith.select %167, %169, %165 : vector<16x128xi1>, vector<16x128xbf16>
    %171 = arith.index_cast %c5_i32 : i32 to index
    %c0_30 = arith.constant 0 : index
    %c0_31 = arith.constant 0 : index
    %172 = vector.load %arg4[%171, %c0_30, %c0_31] : memref<8x16x128xbf16, #tpu.memory_space<vmem>>, vector<1x16x128xbf16>
    %173 = vector.shape_cast %172 : vector<1x16x128xbf16> to vector<16x128xbf16>
    %174 = vector.shape_cast %170 : vector<16x128xbf16> to vector<1x16x128xbf16>
    tpu.vector_store %arg4[%171, %c0_30, %c0_31], %174 {strides = array<i32>} : memref<8x16x128xbf16, #tpu.memory_space<vmem>>, vector<1x16x128xbf16>,
    %c6_i32 = arith.constant 6 : i32
    %175 = arith.index_cast %c6_i32 : i32 to index
    %c0_32 = arith.constant 0 : index
    %c0_33 = arith.constant 0 : index
    %176 = vector.load %arg1[%175, %c0_32, %c0_33] : memref<8x16x128xbf16, #tpu.memory_space<vmem>>, vector<1x16x128xbf16>
    %177 = vector.shape_cast %176 : vector<1x16x128xbf16> to vector<16x128xbf16>
    %178 = vector.shape_cast %6 : vector<16x1xi1> to vector<16x1xi1>
    %179 = vector.broadcast %178 : vector<16x1xi1> to vector<16x128xi1>
    %180 = vector.shape_cast %1 : vector<1x128xbf16> to vector<1x128xbf16>
    %181 = vector.broadcast %180 : vector<1x128xbf16> to vector<16x128xbf16>
    %182 = arith.select %179, %181, %177 : vector<16x128xi1>, vector<16x128xbf16>
    %183 = vector.shape_cast %8 : vector<16x1xi1> to vector<16x1xi1>
    %184 = vector.broadcast %183 : vector<16x1xi1> to vector<16x128xi1>
    %185 = vector.shape_cast %2 : vector<1x128xbf16> to vector<1x128xbf16>
    %186 = vector.broadcast %185 : vector<1x128xbf16> to vector<16x128xbf16>
    %187 = arith.select %184, %186, %182 : vector<16x128xi1>, vector<16x128xbf16>
    %188 = vector.shape_cast %10 : vector<16x1xi1> to vector<16x1xi1>
    %189 = vector.broadcast %188 : vector<16x1xi1> to vector<16x128xi1>
    %190 = vector.shape_cast %3 : vector<1x128xbf16> to vector<1x128xbf16>
    %191 = vector.broadcast %190 : vector<1x128xbf16> to vector<16x128xbf16>
    %192 = arith.select %189, %191, %187 : vector<16x128xi1>, vector<16x128xbf16>
    %193 = vector.shape_cast %12 : vector<16x1xi1> to vector<16x1xi1>
    %194 = vector.broadcast %193 : vector<16x1xi1> to vector<16x128xi1>
    %195 = vector.shape_cast %4 : vector<1x128xbf16> to vector<1x128xbf16>
    %196 = vector.broadcast %195 : vector<1x128xbf16> to vector<16x128xbf16>
    %197 = arith.select %194, %196, %192 : vector<16x128xi1>, vector<16x128xbf16>
    %198 = arith.index_cast %c6_i32 : i32 to index
    %c0_34 = arith.constant 0 : index
    %c0_35 = arith.constant 0 : index
    %199 = vector.load %arg4[%198, %c0_34, %c0_35] : memref<8x16x128xbf16, #tpu.memory_space<vmem>>, vector<1x16x128xbf16>
    %200 = vector.shape_cast %199 : vector<1x16x128xbf16> to vector<16x128xbf16>
    %201 = vector.shape_cast %197 : vector<16x128xbf16> to vector<1x16x128xbf16>
    tpu.vector_store %arg4[%198, %c0_34, %c0_35], %201 {strides = array<i32>} : memref<8x16x128xbf16, #tpu.memory_space<vmem>>, vector<1x16x128xbf16>,
    %c7_i32 = arith.constant 7 : i32
    %202 = arith.index_cast %c7_i32 : i32 to index
    %c0_36 = arith.constant 0 : index
    %c0_37 = arith.constant 0 : index
    %203 = vector.load %arg1[%202, %c0_36, %c0_37] : memref<8x16x128xbf16, #tpu.memory_space<vmem>>, vector<1x16x128xbf16>
    %204 = vector.shape_cast %203 : vector<1x16x128xbf16> to vector<16x128xbf16>
    %205 = vector.shape_cast %6 : vector<16x1xi1> to vector<16x1xi1>
    %206 = vector.broadcast %205 : vector<16x1xi1> to vector<16x128xi1>
    %207 = vector.shape_cast %1 : vector<1x128xbf16> to vector<1x128xbf16>
    %208 = vector.broadcast %207 : vector<1x128xbf16> to vector<16x128xbf16>
    %209 = arith.select %206, %208, %204 : vector<16x128xi1>, vector<16x128xbf16>
    %210 = vector.shape_cast %8 : vector<16x1xi1> to vector<16x1xi1>
    %211 = vector.broadcast %210 : vector<16x1xi1> to vector<16x128xi1>
    %212 = vector.shape_cast %2 : vector<1x128xbf16> to vector<1x128xbf16>
    %213 = vector.broadcast %212 : vector<1x128xbf16> to vector<16x128xbf16>
    %214 = arith.select %211, %213, %209 : vector<16x128xi1>, vector<16x128xbf16>
    %215 = vector.shape_cast %10 : vector<16x1xi1> to vector<16x1xi1>
    %216 = vector.broadcast %215 : vector<16x1xi1> to vector<16x128xi1>
    %217 = vector.shape_cast %3 : vector<1x128xbf16> to vector<1x128xbf16>
    %218 = vector.broadcast %217 : vector<1x128xbf16> to vector<16x128xbf16>
    %219 = arith.select %216, %218, %214 : vector<16x128xi1>, vector<16x128xbf16>
    %220 = vector.shape_cast %12 : vector<16x1xi1> to vector<16x1xi1>
    %221 = vector.broadcast %220 : vector<16x1xi1> to vector<16x128xi1>
    %222 = vector.shape_cast %4 : vector<1x128xbf16> to vector<1x128xbf16>
    %223 = vector.broadcast %222 : vector<1x128xbf16> to vector<16x128xbf16>
    %224 = arith.select %221, %223, %219 : vector<16x128xi1>, vector<16x128xbf16>
    %225 = arith.index_cast %c7_i32 : i32 to index
    %c0_38 = arith.constant 0 : index
    %c0_39 = arith.constant 0 : index
    %226 = vector.load %arg4[%225, %c0_38, %c0_39] : memref<8x16x128xbf16, #tpu.memory_space<vmem>>, vector<1x16x128xbf16>
    %227 = vector.shape_cast %226 : vector<1x16x128xbf16> to vector<16x128xbf16>
    %228 = vector.shape_cast %224 : vector<16x128xbf16> to vector<1x16x128xbf16>
    tpu.vector_store %arg4[%225, %c0_38, %c0_39], %228 {strides = array<i32>} : memref<8x16x128xbf16, #tpu.memory_space<vmem>>, vector<1x16x128xbf16>,
    %c8_i32 = arith.constant 8 : i32
    return
  }
  func.func @transform_0(%arg0: i32) -> (i32, i32, i32) {
    %c0_i32 = arith.constant 0 : i32
    %c0_i32_0 = arith.constant 0 : i32
    %c0_i32_1 = arith.constant 0 : i32
    return %arg0, %c0_i32, %c0_i32_0 : i32, i32, i32
  }
  func.func @transform_1(%arg0: i32) -> i32 {
    %c0_i32 = arith.constant 0 : i32
    %c0_i32_0 = arith.constant 0 : i32
    return %c0_i32 : i32
  }
  func.func @transform_2(%arg0: i32) -> (i32, i32) {
    %c0_i32 = arith.constant 0 : i32
    %c0_i32_0 = arith.constant 0 : i32
    %c0_i32_1 = arith.constant 0 : i32
    return %c0_i32, %c0_i32_0 : i32, i32
  }
  func.func @transform_3(%arg0: i32) -> (i32, i32, i32) {
    %c0_i32 = arith.constant 0 : i32
    %c0_i32_0 = arith.constant 0 : i32
    %c0_i32_1 = arith.constant 0 : i32
    return %arg0, %c0_i32, %c0_i32_0 : i32, i32, i32
  }
}

module attributes {stable_mosaic.version = 11 : i64} {
  func.func @kernel(%arg0: i32, %arg1: memref<8x16x128xbf16, #tpu.memory_space<vmem>>, %arg2: memref<8xi32, #tpu.memory_space<smem>>, %arg3: memref<1x128xbf16, #tpu.memory_space<vmem>>, %arg4: memref<3x128xbf16, #tpu.memory_space<vmem>>, %arg5: memref<8x16x128xbf16, #tpu.memory_space<vmem>>) attributes {dimension_semantics = [#tpu.dimension_semantics<parallel>], iteration_bounds = array<i64: 1>, scalar_prefetch = 0 : i64, scratch_operands = 0 : i64, tpu.core_type = #tpu.core_type<tc>, window_params = [{transform_indices = @transform_0, window_bounds = array<i64: 8, 16, 128>}, {transform_indices = @transform_1, window_bounds = array<i64: 8>}, {pipeline_mode = #tpu.pipeline_mode<synchronous>, transform_indices = @transform_2, window_bounds = array<i64: 1, 128>}, {pipeline_mode = #tpu.pipeline_mode<synchronous>, transform_indices = @transform_3, window_bounds = array<i64: 3, 128>}, {transform_indices = @transform_4, window_bounds = array<i64: 8, 16, 128>}]} {
    %c8_i32 = arith.constant 8 : i32
    %0 = arith.muli %arg0, %c8_i32 : i32
    %1 = tpu.iota {dimensions = array<i32: 0>} : vector<16x1xi32>
    %c0 = arith.constant 0 : index
    %c0_0 = arith.constant 0 : index
    %2 = vector.load %arg3[%c0, %c0_0] : memref<1x128xbf16, #tpu.memory_space<vmem>>, vector<1x128xbf16>
    %c0_1 = arith.constant 0 : index
    %c0_2 = arith.constant 0 : index
    %3 = vector.load %arg4[%c0_1, %c0_2] : memref<3x128xbf16, #tpu.memory_space<vmem>>, vector<1x128xbf16>
    %c1 = arith.constant 1 : index
    %c0_3 = arith.constant 0 : index
    %4 = vector.load %arg4[%c1, %c0_3] : memref<3x128xbf16, #tpu.memory_space<vmem>>, vector<1x128xbf16>
    %c2 = arith.constant 2 : index
    %c0_4 = arith.constant 0 : index
    %5 = vector.load %arg4[%c2, %c0_4] : memref<3x128xbf16, #tpu.memory_space<vmem>>, vector<1x128xbf16>
    %c1_i32 = arith.constant 1 : i32
    %6 = vector.broadcast %c1_i32 : i32 to vector<16x1xi32>
    %7 = arith.cmpi eq, %1, %6 : vector<16x1xi32>
    %c0_i32 = arith.constant 0 : i32
    %8 = arith.index_cast %c0_i32 : i32 to index
    %c0_5 = arith.constant 0 : index
    %c0_6 = arith.constant 0 : index
    %9 = vector.load %arg1[%8, %c0_5, %c0_6] : memref<8x16x128xbf16, #tpu.memory_space<vmem>>, vector<1x16x128xbf16>
    %10 = vector.shape_cast %9 : vector<1x16x128xbf16> to vector<16x128xbf16>
    %11 = vector.shape_cast %7 : vector<16x1xi1> to vector<16x1xi1>
    %12 = vector.broadcast %11 : vector<16x1xi1> to vector<16x128xi1>
    %13 = vector.shape_cast %2 : vector<1x128xbf16> to vector<1x128xbf16>
    %14 = vector.broadcast %13 : vector<1x128xbf16> to vector<16x128xbf16>
    %15 = arith.select %12, %14, %10 : vector<16x128xi1>, vector<16x128xbf16>
    %16 = arith.addi %0, %c0_i32 : i32
    %17 = arith.index_cast %16 : i32 to index
    %18 = memref.load %arg2[%17] : memref<8xi32, #tpu.memory_space<smem>>
    %c2_i32 = arith.constant 2 : i32
    %19 = arith.addi %c2_i32, %18 : i32
    %c0_i32_7 = arith.constant 0 : i32
    %20 = arith.addi %19, %c0_i32_7 : i32
    %21 = vector.broadcast %20 : i32 to vector<16x1xi32>
    %22 = arith.cmpi eq, %1, %21 : vector<16x1xi32>
    %23 = vector.shape_cast %22 : vector<16x1xi1> to vector<16x1xi1>
    %24 = vector.broadcast %23 : vector<16x1xi1> to vector<16x128xi1>
    %25 = vector.shape_cast %3 : vector<1x128xbf16> to vector<1x128xbf16>
    %26 = vector.broadcast %25 : vector<1x128xbf16> to vector<16x128xbf16>
    %27 = arith.select %24, %26, %15 : vector<16x128xi1>, vector<16x128xbf16>
    %c1_i32_8 = arith.constant 1 : i32
    %28 = arith.addi %19, %c1_i32_8 : i32
    %29 = vector.broadcast %28 : i32 to vector<16x1xi32>
    %30 = arith.cmpi eq, %1, %29 : vector<16x1xi32>
    %31 = vector.shape_cast %30 : vector<16x1xi1> to vector<16x1xi1>
    %32 = vector.broadcast %31 : vector<16x1xi1> to vector<16x128xi1>
    %33 = vector.shape_cast %4 : vector<1x128xbf16> to vector<1x128xbf16>
    %34 = vector.broadcast %33 : vector<1x128xbf16> to vector<16x128xbf16>
    %35 = arith.select %32, %34, %27 : vector<16x128xi1>, vector<16x128xbf16>
    %c2_i32_9 = arith.constant 2 : i32
    %36 = arith.addi %19, %c2_i32_9 : i32
    %37 = vector.broadcast %36 : i32 to vector<16x1xi32>
    %38 = arith.cmpi eq, %1, %37 : vector<16x1xi32>
    %39 = vector.shape_cast %38 : vector<16x1xi1> to vector<16x1xi1>
    %40 = vector.broadcast %39 : vector<16x1xi1> to vector<16x128xi1>
    %41 = vector.shape_cast %5 : vector<1x128xbf16> to vector<1x128xbf16>
    %42 = vector.broadcast %41 : vector<1x128xbf16> to vector<16x128xbf16>
    %43 = arith.select %40, %42, %35 : vector<16x128xi1>, vector<16x128xbf16>
    %44 = arith.index_cast %c0_i32 : i32 to index
    %c0_10 = arith.constant 0 : index
    %c0_11 = arith.constant 0 : index
    %45 = vector.load %arg5[%44, %c0_10, %c0_11] : memref<8x16x128xbf16, #tpu.memory_space<vmem>>, vector<1x16x128xbf16>
    %46 = vector.shape_cast %45 : vector<1x16x128xbf16> to vector<16x128xbf16>
    %47 = vector.shape_cast %43 : vector<16x128xbf16> to vector<1x16x128xbf16>
    tpu.vector_store %arg5[%44, %c0_10, %c0_11], %47 {strides = array<i32>} : memref<8x16x128xbf16, #tpu.memory_space<vmem>>, vector<1x16x128xbf16>,
    %c1_i32_12 = arith.constant 1 : i32
    %48 = arith.index_cast %c1_i32_12 : i32 to index
    %c0_13 = arith.constant 0 : index
    %c0_14 = arith.constant 0 : index
    %49 = vector.load %arg1[%48, %c0_13, %c0_14] : memref<8x16x128xbf16, #tpu.memory_space<vmem>>, vector<1x16x128xbf16>
    %50 = vector.shape_cast %49 : vector<1x16x128xbf16> to vector<16x128xbf16>
    %51 = vector.shape_cast %7 : vector<16x1xi1> to vector<16x1xi1>
    %52 = vector.broadcast %51 : vector<16x1xi1> to vector<16x128xi1>
    %53 = vector.shape_cast %2 : vector<1x128xbf16> to vector<1x128xbf16>
    %54 = vector.broadcast %53 : vector<1x128xbf16> to vector<16x128xbf16>
    %55 = arith.select %52, %54, %50 : vector<16x128xi1>, vector<16x128xbf16>
    %56 = arith.addi %0, %c1_i32_12 : i32
    %57 = arith.index_cast %56 : i32 to index
    %58 = memref.load %arg2[%57] : memref<8xi32, #tpu.memory_space<smem>>
    %c2_i32_15 = arith.constant 2 : i32
    %59 = arith.addi %c2_i32_15, %58 : i32
    %c0_i32_16 = arith.constant 0 : i32
    %60 = arith.addi %59, %c0_i32_16 : i32
    %61 = vector.broadcast %60 : i32 to vector<16x1xi32>
    %62 = arith.cmpi eq, %1, %61 : vector<16x1xi32>
    %63 = vector.shape_cast %62 : vector<16x1xi1> to vector<16x1xi1>
    %64 = vector.broadcast %63 : vector<16x1xi1> to vector<16x128xi1>
    %65 = vector.shape_cast %3 : vector<1x128xbf16> to vector<1x128xbf16>
    %66 = vector.broadcast %65 : vector<1x128xbf16> to vector<16x128xbf16>
    %67 = arith.select %64, %66, %55 : vector<16x128xi1>, vector<16x128xbf16>
    %c1_i32_17 = arith.constant 1 : i32
    %68 = arith.addi %59, %c1_i32_17 : i32
    %69 = vector.broadcast %68 : i32 to vector<16x1xi32>
    %70 = arith.cmpi eq, %1, %69 : vector<16x1xi32>
    %71 = vector.shape_cast %70 : vector<16x1xi1> to vector<16x1xi1>
    %72 = vector.broadcast %71 : vector<16x1xi1> to vector<16x128xi1>
    %73 = vector.shape_cast %4 : vector<1x128xbf16> to vector<1x128xbf16>
    %74 = vector.broadcast %73 : vector<1x128xbf16> to vector<16x128xbf16>
    %75 = arith.select %72, %74, %67 : vector<16x128xi1>, vector<16x128xbf16>
    %c2_i32_18 = arith.constant 2 : i32
    %76 = arith.addi %59, %c2_i32_18 : i32
    %77 = vector.broadcast %76 : i32 to vector<16x1xi32>
    %78 = arith.cmpi eq, %1, %77 : vector<16x1xi32>
    %79 = vector.shape_cast %78 : vector<16x1xi1> to vector<16x1xi1>
    %80 = vector.broadcast %79 : vector<16x1xi1> to vector<16x128xi1>
    %81 = vector.shape_cast %5 : vector<1x128xbf16> to vector<1x128xbf16>
    %82 = vector.broadcast %81 : vector<1x128xbf16> to vector<16x128xbf16>
    %83 = arith.select %80, %82, %75 : vector<16x128xi1>, vector<16x128xbf16>
    %84 = arith.index_cast %c1_i32_12 : i32 to index
    %c0_19 = arith.constant 0 : index
    %c0_20 = arith.constant 0 : index
    %85 = vector.load %arg5[%84, %c0_19, %c0_20] : memref<8x16x128xbf16, #tpu.memory_space<vmem>>, vector<1x16x128xbf16>
    %86 = vector.shape_cast %85 : vector<1x16x128xbf16> to vector<16x128xbf16>
    %87 = vector.shape_cast %83 : vector<16x128xbf16> to vector<1x16x128xbf16>
    tpu.vector_store %arg5[%84, %c0_19, %c0_20], %87 {strides = array<i32>} : memref<8x16x128xbf16, #tpu.memory_space<vmem>>, vector<1x16x128xbf16>,
    %c2_i32_21 = arith.constant 2 : i32
    %88 = arith.index_cast %c2_i32_21 : i32 to index
    %c0_22 = arith.constant 0 : index
    %c0_23 = arith.constant 0 : index
    %89 = vector.load %arg1[%88, %c0_22, %c0_23] : memref<8x16x128xbf16, #tpu.memory_space<vmem>>, vector<1x16x128xbf16>
    %90 = vector.shape_cast %89 : vector<1x16x128xbf16> to vector<16x128xbf16>
    %91 = vector.shape_cast %7 : vector<16x1xi1> to vector<16x1xi1>
    %92 = vector.broadcast %91 : vector<16x1xi1> to vector<16x128xi1>
    %93 = vector.shape_cast %2 : vector<1x128xbf16> to vector<1x128xbf16>
    %94 = vector.broadcast %93 : vector<1x128xbf16> to vector<16x128xbf16>
    %95 = arith.select %92, %94, %90 : vector<16x128xi1>, vector<16x128xbf16>
    %96 = arith.addi %0, %c2_i32_21 : i32
    %97 = arith.index_cast %96 : i32 to index
    %98 = memref.load %arg2[%97] : memref<8xi32, #tpu.memory_space<smem>>
    %c2_i32_24 = arith.constant 2 : i32
    %99 = arith.addi %c2_i32_24, %98 : i32
    %c0_i32_25 = arith.constant 0 : i32
    %100 = arith.addi %99, %c0_i32_25 : i32
    %101 = vector.broadcast %100 : i32 to vector<16x1xi32>
    %102 = arith.cmpi eq, %1, %101 : vector<16x1xi32>
    %103 = vector.shape_cast %102 : vector<16x1xi1> to vector<16x1xi1>
    %104 = vector.broadcast %103 : vector<16x1xi1> to vector<16x128xi1>
    %105 = vector.shape_cast %3 : vector<1x128xbf16> to vector<1x128xbf16>
    %106 = vector.broadcast %105 : vector<1x128xbf16> to vector<16x128xbf16>
    %107 = arith.select %104, %106, %95 : vector<16x128xi1>, vector<16x128xbf16>
    %c1_i32_26 = arith.constant 1 : i32
    %108 = arith.addi %99, %c1_i32_26 : i32
    %109 = vector.broadcast %108 : i32 to vector<16x1xi32>
    %110 = arith.cmpi eq, %1, %109 : vector<16x1xi32>
    %111 = vector.shape_cast %110 : vector<16x1xi1> to vector<16x1xi1>
    %112 = vector.broadcast %111 : vector<16x1xi1> to vector<16x128xi1>
    %113 = vector.shape_cast %4 : vector<1x128xbf16> to vector<1x128xbf16>
    %114 = vector.broadcast %113 : vector<1x128xbf16> to vector<16x128xbf16>
    %115 = arith.select %112, %114, %107 : vector<16x128xi1>, vector<16x128xbf16>
    %c2_i32_27 = arith.constant 2 : i32
    %116 = arith.addi %99, %c2_i32_27 : i32
    %117 = vector.broadcast %116 : i32 to vector<16x1xi32>
    %118 = arith.cmpi eq, %1, %117 : vector<16x1xi32>
    %119 = vector.shape_cast %118 : vector<16x1xi1> to vector<16x1xi1>
    %120 = vector.broadcast %119 : vector<16x1xi1> to vector<16x128xi1>
    %121 = vector.shape_cast %5 : vector<1x128xbf16> to vector<1x128xbf16>
    %122 = vector.broadcast %121 : vector<1x128xbf16> to vector<16x128xbf16>
    %123 = arith.select %120, %122, %115 : vector<16x128xi1>, vector<16x128xbf16>
    %124 = arith.index_cast %c2_i32_21 : i32 to index
    %c0_28 = arith.constant 0 : index
    %c0_29 = arith.constant 0 : index
    %125 = vector.load %arg5[%124, %c0_28, %c0_29] : memref<8x16x128xbf16, #tpu.memory_space<vmem>>, vector<1x16x128xbf16>
    %126 = vector.shape_cast %125 : vector<1x16x128xbf16> to vector<16x128xbf16>
    %127 = vector.shape_cast %123 : vector<16x128xbf16> to vector<1x16x128xbf16>
    tpu.vector_store %arg5[%124, %c0_28, %c0_29], %127 {strides = array<i32>} : memref<8x16x128xbf16, #tpu.memory_space<vmem>>, vector<1x16x128xbf16>,
    %c3_i32 = arith.constant 3 : i32
    %128 = arith.index_cast %c3_i32 : i32 to index
    %c0_30 = arith.constant 0 : index
    %c0_31 = arith.constant 0 : index
    %129 = vector.load %arg1[%128, %c0_30, %c0_31] : memref<8x16x128xbf16, #tpu.memory_space<vmem>>, vector<1x16x128xbf16>
    %130 = vector.shape_cast %129 : vector<1x16x128xbf16> to vector<16x128xbf16>
    %131 = vector.shape_cast %7 : vector<16x1xi1> to vector<16x1xi1>
    %132 = vector.broadcast %131 : vector<16x1xi1> to vector<16x128xi1>
    %133 = vector.shape_cast %2 : vector<1x128xbf16> to vector<1x128xbf16>
    %134 = vector.broadcast %133 : vector<1x128xbf16> to vector<16x128xbf16>
    %135 = arith.select %132, %134, %130 : vector<16x128xi1>, vector<16x128xbf16>
    %136 = arith.addi %0, %c3_i32 : i32
    %137 = arith.index_cast %136 : i32 to index
    %138 = memref.load %arg2[%137] : memref<8xi32, #tpu.memory_space<smem>>
    %c2_i32_32 = arith.constant 2 : i32
    %139 = arith.addi %c2_i32_32, %138 : i32
    %c0_i32_33 = arith.constant 0 : i32
    %140 = arith.addi %139, %c0_i32_33 : i32
    %141 = vector.broadcast %140 : i32 to vector<16x1xi32>
    %142 = arith.cmpi eq, %1, %141 : vector<16x1xi32>
    %143 = vector.shape_cast %142 : vector<16x1xi1> to vector<16x1xi1>
    %144 = vector.broadcast %143 : vector<16x1xi1> to vector<16x128xi1>
    %145 = vector.shape_cast %3 : vector<1x128xbf16> to vector<1x128xbf16>
    %146 = vector.broadcast %145 : vector<1x128xbf16> to vector<16x128xbf16>
    %147 = arith.select %144, %146, %135 : vector<16x128xi1>, vector<16x128xbf16>
    %c1_i32_34 = arith.constant 1 : i32
    %148 = arith.addi %139, %c1_i32_34 : i32
    %149 = vector.broadcast %148 : i32 to vector<16x1xi32>
    %150 = arith.cmpi eq, %1, %149 : vector<16x1xi32>
    %151 = vector.shape_cast %150 : vector<16x1xi1> to vector<16x1xi1>
    %152 = vector.broadcast %151 : vector<16x1xi1> to vector<16x128xi1>
    %153 = vector.shape_cast %4 : vector<1x128xbf16> to vector<1x128xbf16>
    %154 = vector.broadcast %153 : vector<1x128xbf16> to vector<16x128xbf16>
    %155 = arith.select %152, %154, %147 : vector<16x128xi1>, vector<16x128xbf16>
    %c2_i32_35 = arith.constant 2 : i32
    %156 = arith.addi %139, %c2_i32_35 : i32
    %157 = vector.broadcast %156 : i32 to vector<16x1xi32>
    %158 = arith.cmpi eq, %1, %157 : vector<16x1xi32>
    %159 = vector.shape_cast %158 : vector<16x1xi1> to vector<16x1xi1>
    %160 = vector.broadcast %159 : vector<16x1xi1> to vector<16x128xi1>
    %161 = vector.shape_cast %5 : vector<1x128xbf16> to vector<1x128xbf16>
    %162 = vector.broadcast %161 : vector<1x128xbf16> to vector<16x128xbf16>
    %163 = arith.select %160, %162, %155 : vector<16x128xi1>, vector<16x128xbf16>
    %164 = arith.index_cast %c3_i32 : i32 to index
    %c0_36 = arith.constant 0 : index
    %c0_37 = arith.constant 0 : index
    %165 = vector.load %arg5[%164, %c0_36, %c0_37] : memref<8x16x128xbf16, #tpu.memory_space<vmem>>, vector<1x16x128xbf16>
    %166 = vector.shape_cast %165 : vector<1x16x128xbf16> to vector<16x128xbf16>
    %167 = vector.shape_cast %163 : vector<16x128xbf16> to vector<1x16x128xbf16>
    tpu.vector_store %arg5[%164, %c0_36, %c0_37], %167 {strides = array<i32>} : memref<8x16x128xbf16, #tpu.memory_space<vmem>>, vector<1x16x128xbf16>,
    %c4_i32 = arith.constant 4 : i32
    %168 = arith.index_cast %c4_i32 : i32 to index
    %c0_38 = arith.constant 0 : index
    %c0_39 = arith.constant 0 : index
    %169 = vector.load %arg1[%168, %c0_38, %c0_39] : memref<8x16x128xbf16, #tpu.memory_space<vmem>>, vector<1x16x128xbf16>
    %170 = vector.shape_cast %169 : vector<1x16x128xbf16> to vector<16x128xbf16>
    %171 = vector.shape_cast %7 : vector<16x1xi1> to vector<16x1xi1>
    %172 = vector.broadcast %171 : vector<16x1xi1> to vector<16x128xi1>
    %173 = vector.shape_cast %2 : vector<1x128xbf16> to vector<1x128xbf16>
    %174 = vector.broadcast %173 : vector<1x128xbf16> to vector<16x128xbf16>
    %175 = arith.select %172, %174, %170 : vector<16x128xi1>, vector<16x128xbf16>
    %176 = arith.addi %0, %c4_i32 : i32
    %177 = arith.index_cast %176 : i32 to index
    %178 = memref.load %arg2[%177] : memref<8xi32, #tpu.memory_space<smem>>
    %c2_i32_40 = arith.constant 2 : i32
    %179 = arith.addi %c2_i32_40, %178 : i32
    %c0_i32_41 = arith.constant 0 : i32
    %180 = arith.addi %179, %c0_i32_41 : i32
    %181 = vector.broadcast %180 : i32 to vector<16x1xi32>
    %182 = arith.cmpi eq, %1, %181 : vector<16x1xi32>
    %183 = vector.shape_cast %182 : vector<16x1xi1> to vector<16x1xi1>
    %184 = vector.broadcast %183 : vector<16x1xi1> to vector<16x128xi1>
    %185 = vector.shape_cast %3 : vector<1x128xbf16> to vector<1x128xbf16>
    %186 = vector.broadcast %185 : vector<1x128xbf16> to vector<16x128xbf16>
    %187 = arith.select %184, %186, %175 : vector<16x128xi1>, vector<16x128xbf16>
    %c1_i32_42 = arith.constant 1 : i32
    %188 = arith.addi %179, %c1_i32_42 : i32
    %189 = vector.broadcast %188 : i32 to vector<16x1xi32>
    %190 = arith.cmpi eq, %1, %189 : vector<16x1xi32>
    %191 = vector.shape_cast %190 : vector<16x1xi1> to vector<16x1xi1>
    %192 = vector.broadcast %191 : vector<16x1xi1> to vector<16x128xi1>
    %193 = vector.shape_cast %4 : vector<1x128xbf16> to vector<1x128xbf16>
    %194 = vector.broadcast %193 : vector<1x128xbf16> to vector<16x128xbf16>
    %195 = arith.select %192, %194, %187 : vector<16x128xi1>, vector<16x128xbf16>
    %c2_i32_43 = arith.constant 2 : i32
    %196 = arith.addi %179, %c2_i32_43 : i32
    %197 = vector.broadcast %196 : i32 to vector<16x1xi32>
    %198 = arith.cmpi eq, %1, %197 : vector<16x1xi32>
    %199 = vector.shape_cast %198 : vector<16x1xi1> to vector<16x1xi1>
    %200 = vector.broadcast %199 : vector<16x1xi1> to vector<16x128xi1>
    %201 = vector.shape_cast %5 : vector<1x128xbf16> to vector<1x128xbf16>
    %202 = vector.broadcast %201 : vector<1x128xbf16> to vector<16x128xbf16>
    %203 = arith.select %200, %202, %195 : vector<16x128xi1>, vector<16x128xbf16>
    %204 = arith.index_cast %c4_i32 : i32 to index
    %c0_44 = arith.constant 0 : index
    %c0_45 = arith.constant 0 : index
    %205 = vector.load %arg5[%204, %c0_44, %c0_45] : memref<8x16x128xbf16, #tpu.memory_space<vmem>>, vector<1x16x128xbf16>
    %206 = vector.shape_cast %205 : vector<1x16x128xbf16> to vector<16x128xbf16>
    %207 = vector.shape_cast %203 : vector<16x128xbf16> to vector<1x16x128xbf16>
    tpu.vector_store %arg5[%204, %c0_44, %c0_45], %207 {strides = array<i32>} : memref<8x16x128xbf16, #tpu.memory_space<vmem>>, vector<1x16x128xbf16>,
    %c5_i32 = arith.constant 5 : i32
    %208 = arith.index_cast %c5_i32 : i32 to index
    %c0_46 = arith.constant 0 : index
    %c0_47 = arith.constant 0 : index
    %209 = vector.load %arg1[%208, %c0_46, %c0_47] : memref<8x16x128xbf16, #tpu.memory_space<vmem>>, vector<1x16x128xbf16>
    %210 = vector.shape_cast %209 : vector<1x16x128xbf16> to vector<16x128xbf16>
    %211 = vector.shape_cast %7 : vector<16x1xi1> to vector<16x1xi1>
    %212 = vector.broadcast %211 : vector<16x1xi1> to vector<16x128xi1>
    %213 = vector.shape_cast %2 : vector<1x128xbf16> to vector<1x128xbf16>
    %214 = vector.broadcast %213 : vector<1x128xbf16> to vector<16x128xbf16>
    %215 = arith.select %212, %214, %210 : vector<16x128xi1>, vector<16x128xbf16>
    %216 = arith.addi %0, %c5_i32 : i32
    %217 = arith.index_cast %216 : i32 to index
    %218 = memref.load %arg2[%217] : memref<8xi32, #tpu.memory_space<smem>>
    %c2_i32_48 = arith.constant 2 : i32
    %219 = arith.addi %c2_i32_48, %218 : i32
    %c0_i32_49 = arith.constant 0 : i32
    %220 = arith.addi %219, %c0_i32_49 : i32
    %221 = vector.broadcast %220 : i32 to vector<16x1xi32>
    %222 = arith.cmpi eq, %1, %221 : vector<16x1xi32>
    %223 = vector.shape_cast %222 : vector<16x1xi1> to vector<16x1xi1>
    %224 = vector.broadcast %223 : vector<16x1xi1> to vector<16x128xi1>
    %225 = vector.shape_cast %3 : vector<1x128xbf16> to vector<1x128xbf16>
    %226 = vector.broadcast %225 : vector<1x128xbf16> to vector<16x128xbf16>
    %227 = arith.select %224, %226, %215 : vector<16x128xi1>, vector<16x128xbf16>
    %c1_i32_50 = arith.constant 1 : i32
    %228 = arith.addi %219, %c1_i32_50 : i32
    %229 = vector.broadcast %228 : i32 to vector<16x1xi32>
    %230 = arith.cmpi eq, %1, %229 : vector<16x1xi32>
    %231 = vector.shape_cast %230 : vector<16x1xi1> to vector<16x1xi1>
    %232 = vector.broadcast %231 : vector<16x1xi1> to vector<16x128xi1>
    %233 = vector.shape_cast %4 : vector<1x128xbf16> to vector<1x128xbf16>
    %234 = vector.broadcast %233 : vector<1x128xbf16> to vector<16x128xbf16>
    %235 = arith.select %232, %234, %227 : vector<16x128xi1>, vector<16x128xbf16>
    %c2_i32_51 = arith.constant 2 : i32
    %236 = arith.addi %219, %c2_i32_51 : i32
    %237 = vector.broadcast %236 : i32 to vector<16x1xi32>
    %238 = arith.cmpi eq, %1, %237 : vector<16x1xi32>
    %239 = vector.shape_cast %238 : vector<16x1xi1> to vector<16x1xi1>
    %240 = vector.broadcast %239 : vector<16x1xi1> to vector<16x128xi1>
    %241 = vector.shape_cast %5 : vector<1x128xbf16> to vector<1x128xbf16>
    %242 = vector.broadcast %241 : vector<1x128xbf16> to vector<16x128xbf16>
    %243 = arith.select %240, %242, %235 : vector<16x128xi1>, vector<16x128xbf16>
    %244 = arith.index_cast %c5_i32 : i32 to index
    %c0_52 = arith.constant 0 : index
    %c0_53 = arith.constant 0 : index
    %245 = vector.load %arg5[%244, %c0_52, %c0_53] : memref<8x16x128xbf16, #tpu.memory_space<vmem>>, vector<1x16x128xbf16>
    %246 = vector.shape_cast %245 : vector<1x16x128xbf16> to vector<16x128xbf16>
    %247 = vector.shape_cast %243 : vector<16x128xbf16> to vector<1x16x128xbf16>
    tpu.vector_store %arg5[%244, %c0_52, %c0_53], %247 {strides = array<i32>} : memref<8x16x128xbf16, #tpu.memory_space<vmem>>, vector<1x16x128xbf16>,
    %c6_i32 = arith.constant 6 : i32
    %248 = arith.index_cast %c6_i32 : i32 to index
    %c0_54 = arith.constant 0 : index
    %c0_55 = arith.constant 0 : index
    %249 = vector.load %arg1[%248, %c0_54, %c0_55] : memref<8x16x128xbf16, #tpu.memory_space<vmem>>, vector<1x16x128xbf16>
    %250 = vector.shape_cast %249 : vector<1x16x128xbf16> to vector<16x128xbf16>
    %251 = vector.shape_cast %7 : vector<16x1xi1> to vector<16x1xi1>
    %252 = vector.broadcast %251 : vector<16x1xi1> to vector<16x128xi1>
    %253 = vector.shape_cast %2 : vector<1x128xbf16> to vector<1x128xbf16>
    %254 = vector.broadcast %253 : vector<1x128xbf16> to vector<16x128xbf16>
    %255 = arith.select %252, %254, %250 : vector<16x128xi1>, vector<16x128xbf16>
    %256 = arith.addi %0, %c6_i32 : i32
    %257 = arith.index_cast %256 : i32 to index
    %258 = memref.load %arg2[%257] : memref<8xi32, #tpu.memory_space<smem>>
    %c2_i32_56 = arith.constant 2 : i32
    %259 = arith.addi %c2_i32_56, %258 : i32
    %c0_i32_57 = arith.constant 0 : i32
    %260 = arith.addi %259, %c0_i32_57 : i32
    %261 = vector.broadcast %260 : i32 to vector<16x1xi32>
    %262 = arith.cmpi eq, %1, %261 : vector<16x1xi32>
    %263 = vector.shape_cast %262 : vector<16x1xi1> to vector<16x1xi1>
    %264 = vector.broadcast %263 : vector<16x1xi1> to vector<16x128xi1>
    %265 = vector.shape_cast %3 : vector<1x128xbf16> to vector<1x128xbf16>
    %266 = vector.broadcast %265 : vector<1x128xbf16> to vector<16x128xbf16>
    %267 = arith.select %264, %266, %255 : vector<16x128xi1>, vector<16x128xbf16>
    %c1_i32_58 = arith.constant 1 : i32
    %268 = arith.addi %259, %c1_i32_58 : i32
    %269 = vector.broadcast %268 : i32 to vector<16x1xi32>
    %270 = arith.cmpi eq, %1, %269 : vector<16x1xi32>
    %271 = vector.shape_cast %270 : vector<16x1xi1> to vector<16x1xi1>
    %272 = vector.broadcast %271 : vector<16x1xi1> to vector<16x128xi1>
    %273 = vector.shape_cast %4 : vector<1x128xbf16> to vector<1x128xbf16>
    %274 = vector.broadcast %273 : vector<1x128xbf16> to vector<16x128xbf16>
    %275 = arith.select %272, %274, %267 : vector<16x128xi1>, vector<16x128xbf16>
    %c2_i32_59 = arith.constant 2 : i32
    %276 = arith.addi %259, %c2_i32_59 : i32
    %277 = vector.broadcast %276 : i32 to vector<16x1xi32>
    %278 = arith.cmpi eq, %1, %277 : vector<16x1xi32>
    %279 = vector.shape_cast %278 : vector<16x1xi1> to vector<16x1xi1>
    %280 = vector.broadcast %279 : vector<16x1xi1> to vector<16x128xi1>
    %281 = vector.shape_cast %5 : vector<1x128xbf16> to vector<1x128xbf16>
    %282 = vector.broadcast %281 : vector<1x128xbf16> to vector<16x128xbf16>
    %283 = arith.select %280, %282, %275 : vector<16x128xi1>, vector<16x128xbf16>
    %284 = arith.index_cast %c6_i32 : i32 to index
    %c0_60 = arith.constant 0 : index
    %c0_61 = arith.constant 0 : index
    %285 = vector.load %arg5[%284, %c0_60, %c0_61] : memref<8x16x128xbf16, #tpu.memory_space<vmem>>, vector<1x16x128xbf16>
    %286 = vector.shape_cast %285 : vector<1x16x128xbf16> to vector<16x128xbf16>
    %287 = vector.shape_cast %283 : vector<16x128xbf16> to vector<1x16x128xbf16>
    tpu.vector_store %arg5[%284, %c0_60, %c0_61], %287 {strides = array<i32>} : memref<8x16x128xbf16, #tpu.memory_space<vmem>>, vector<1x16x128xbf16>,
    %c7_i32 = arith.constant 7 : i32
    %288 = arith.index_cast %c7_i32 : i32 to index
    %c0_62 = arith.constant 0 : index
    %c0_63 = arith.constant 0 : index
    %289 = vector.load %arg1[%288, %c0_62, %c0_63] : memref<8x16x128xbf16, #tpu.memory_space<vmem>>, vector<1x16x128xbf16>
    %290 = vector.shape_cast %289 : vector<1x16x128xbf16> to vector<16x128xbf16>
    %291 = vector.shape_cast %7 : vector<16x1xi1> to vector<16x1xi1>
    %292 = vector.broadcast %291 : vector<16x1xi1> to vector<16x128xi1>
    %293 = vector.shape_cast %2 : vector<1x128xbf16> to vector<1x128xbf16>
    %294 = vector.broadcast %293 : vector<1x128xbf16> to vector<16x128xbf16>
    %295 = arith.select %292, %294, %290 : vector<16x128xi1>, vector<16x128xbf16>
    %296 = arith.addi %0, %c7_i32 : i32
    %297 = arith.index_cast %296 : i32 to index
    %298 = memref.load %arg2[%297] : memref<8xi32, #tpu.memory_space<smem>>
    %c2_i32_64 = arith.constant 2 : i32
    %299 = arith.addi %c2_i32_64, %298 : i32
    %c0_i32_65 = arith.constant 0 : i32
    %300 = arith.addi %299, %c0_i32_65 : i32
    %301 = vector.broadcast %300 : i32 to vector<16x1xi32>
    %302 = arith.cmpi eq, %1, %301 : vector<16x1xi32>
    %303 = vector.shape_cast %302 : vector<16x1xi1> to vector<16x1xi1>
    %304 = vector.broadcast %303 : vector<16x1xi1> to vector<16x128xi1>
    %305 = vector.shape_cast %3 : vector<1x128xbf16> to vector<1x128xbf16>
    %306 = vector.broadcast %305 : vector<1x128xbf16> to vector<16x128xbf16>
    %307 = arith.select %304, %306, %295 : vector<16x128xi1>, vector<16x128xbf16>
    %c1_i32_66 = arith.constant 1 : i32
    %308 = arith.addi %299, %c1_i32_66 : i32
    %309 = vector.broadcast %308 : i32 to vector<16x1xi32>
    %310 = arith.cmpi eq, %1, %309 : vector<16x1xi32>
    %311 = vector.shape_cast %310 : vector<16x1xi1> to vector<16x1xi1>
    %312 = vector.broadcast %311 : vector<16x1xi1> to vector<16x128xi1>
    %313 = vector.shape_cast %4 : vector<1x128xbf16> to vector<1x128xbf16>
    %314 = vector.broadcast %313 : vector<1x128xbf16> to vector<16x128xbf16>
    %315 = arith.select %312, %314, %307 : vector<16x128xi1>, vector<16x128xbf16>
    %c2_i32_67 = arith.constant 2 : i32
    %316 = arith.addi %299, %c2_i32_67 : i32
    %317 = vector.broadcast %316 : i32 to vector<16x1xi32>
    %318 = arith.cmpi eq, %1, %317 : vector<16x1xi32>
    %319 = vector.shape_cast %318 : vector<16x1xi1> to vector<16x1xi1>
    %320 = vector.broadcast %319 : vector<16x1xi1> to vector<16x128xi1>
    %321 = vector.shape_cast %5 : vector<1x128xbf16> to vector<1x128xbf16>
    %322 = vector.broadcast %321 : vector<1x128xbf16> to vector<16x128xbf16>
    %323 = arith.select %320, %322, %315 : vector<16x128xi1>, vector<16x128xbf16>
    %324 = arith.index_cast %c7_i32 : i32 to index
    %c0_68 = arith.constant 0 : index
    %c0_69 = arith.constant 0 : index
    %325 = vector.load %arg5[%324, %c0_68, %c0_69] : memref<8x16x128xbf16, #tpu.memory_space<vmem>>, vector<1x16x128xbf16>
    %326 = vector.shape_cast %325 : vector<1x16x128xbf16> to vector<16x128xbf16>
    %327 = vector.shape_cast %323 : vector<16x128xbf16> to vector<1x16x128xbf16>
    tpu.vector_store %arg5[%324, %c0_68, %c0_69], %327 {strides = array<i32>} : memref<8x16x128xbf16, #tpu.memory_space<vmem>>, vector<1x16x128xbf16>,
    %c8_i32_70 = arith.constant 8 : i32
    return
  }
  func.func @transform_0(%arg0: i32) -> (i32, i32, i32) {
    %c0_i32 = arith.constant 0 : i32
    %c0_i32_0 = arith.constant 0 : i32
    %c0_i32_1 = arith.constant 0 : i32
    return %arg0, %c0_i32, %c0_i32_0 : i32, i32, i32
  }
  func.func @transform_1(%arg0: i32) -> i32 {
    %c0_i32 = arith.constant 0 : i32
    %c0_i32_0 = arith.constant 0 : i32
    return %c0_i32 : i32
  }
  func.func @transform_2(%arg0: i32) -> (i32, i32) {
    %c0_i32 = arith.constant 0 : i32
    %c0_i32_0 = arith.constant 0 : i32
    %c0_i32_1 = arith.constant 0 : i32
    return %c0_i32, %c0_i32_0 : i32, i32
  }
  func.func @transform_3(%arg0: i32) -> (i32, i32) {
    %c0_i32 = arith.constant 0 : i32
    %c0_i32_0 = arith.constant 0 : i32
    %c0_i32_1 = arith.constant 0 : i32
    return %c0_i32, %c0_i32_0 : i32, i32
  }
  func.func @transform_4(%arg0: i32) -> (i32, i32, i32) {
    %c0_i32 = arith.constant 0 : i32
    %c0_i32_0 = arith.constant 0 : i32
    %c0_i32_1 = arith.constant 0 : i32
    return %arg0, %c0_i32, %c0_i32_0 : i32, i32, i32
  }
}

</mosaic_0001>

<bundles_post_ra>
// kernel: _forward_impl.2
= control target key start
LH: loop header
LB: loop body
LE: loop exit
PB: predicated region body
PF: predicated region fallthrough
CT: control target
= control target key end

     0   :  { %8 = vsyncpa [#allocation3], 0  ;;  %s640_s0 = inlined_call_operand.hbm [shape: bf16[8,32,128], index: 0, kind: input, shape index: {}, may-alias: {0,3}]   ;;  %s641_s1 = inlined_call_operand.vmem [shape: s32[8], index: 1, kind: input, shape index: {}]   ;;  %s642_s2 = inlined_call_operand.vmem [shape: bf16[4,128], index: 2, kind: input, shape index: {}]   ;;  %s643_s3 = inlined_call_operand.hbm [shape: bf16[8,32,128], index: 3, kind: output, shape index: {}, may-alias: {0,3}]  }
   0x1   :  { %9 = vsyncpa [#allocation5], 0 }
   0x2   :  { %10 = vsyncpa [#allocation4], 0 }
   0x3   :  { %s20_s12 = sld [smem:[#allocation0]]   ;;  %s463_s13 = smov [#allocation2]  }
   0x4   :  { %s28_s14 = sshll.u32 %s463_s13, 4  ;;  %s464_s15 = smov 256   ;;  %s29_s14 = int_to_ptr.vmem [resolvable:$true] %s28_s14 }
   0x5   :  { %35 = sst [smem:[#allocation9]] %s464_s15  ;;  %s465_s16 = smov 128  }
   0x6   :  { %37 = sst [smem:[#allocation9 + $0x1]] %s465_s16  ;;  %s466_s17 = smov 2  }
   0x7   :  { %39 = sst [smem:[#allocation9 + $0x2]] %s466_s17  ;;  %s467_s19 = smov 64  }
   0x8   :  { %41 = sst [smem:[#allocation9 + $0x3]] %s467_s19  ;;  %s468_s21 = smov 4  }
   0x9   :  { %s387_s18 = sshll.u32 %s20_s12, 26  ;;  %43 = sst [smem:[#allocation9 + $0x4]] %s467_s19 }
   0xa   :  { %s388_s20 = sadd.s32 134217728, %s387_s18  ;;  %45 = sst [smem:[#allocation9 + $0x5]] %s468_s21 }
   0xb   :  { %s469_s22 = smov [#allocation3]   ;;  %s470_s23 = smov [#allocation8]  }
   0xc   :  { %47 = dma.general %s640_s0, 1024, %s29_s14, %s469_s22, %s470_s23, [#allocation9], %s388_s20, 0  }
   0xd   :  { %s54_s28 = sshll.u32 %s641_s1, 4  ;;  %s55_s28 = int_to_ptr.vmem [resolvable:$true] %s54_s28 }
   0xe   :  { %s445_s29 = scalar_lea.vmem %s55_s28, 16  ;;  %p450_p1 = scmp.lt.s32.totalorder %s55_s28, %s55_s28 }
   0xf   :  { %p446_p0 = scmp.ne.s32.totalorder %s55_s28, %s445_s29  ;;  %p451_p2 = scmp.lt.s32.totalorder %s445_s29, %s445_s29 }
  0x11   :  { %p452_p3 = por %p451_p2, %p450_p1 }
  0x13   :  { %p453_p4 = pnand %p452_p3, %p446_p0 }
  0x15   :  { %456 = shalt.err (!%p453_p4)
}
  0x16   :  { %s471_s30 = smov [#allocation6]  }
  0x17   :  { %57 = dma.vmem_to_smem %s55_s28, 16, %s471_s30, [#allocation5]  }
  0x18   :  { %457 = dma.done.wait [#allocation3], 1024  }
  0x19   :  { %458 = vsyncadd [#allocation3], 4294966272 }
  0x1a   :  { %459 = dma.done.wait [#allocation5], 16  }
  0x1b   :  { %460 = vsyncadd [#allocation5], 4294967280 }
  0x1c   :  { %66 = sfence }
  0x1d   :  { %v69_v0 = vlaneseq  ;;  %v72_v1 = vld [vmem:[%s642_s2] sm:$0x1]  ;;  %v73_v2 = vld [vmem:[%s642_s2] sm:$0x2]  ;;  %vm472_vm0 = vmmov 0   ;;  %v473_v7 = vmov 0  }
  0x1e   :  { %v114_v3 = vshrl.u32 %v72_v1, 16  ;;  %vm96_vm1 = vmpackc.low %vm472_vm0, %vm472_vm0  ;;  %v154_v5 = vshrl.u32 %v73_v2, 16  ;;  %v89_v6 = vpack.i.b16 %v72_v1, %v72_v1  ;;  %v135_v10 = vpack.i.b16 %v73_v2, %v73_v2  ;;  %v437_v11 = vld [vmem:[#allocation2] sm:$0xff]   ;;  %v438_v12 = vld [vmem:[#allocation2 + $0x8] sm:$0xff]  }
  0x1f   :  { %v70_v4 = vshrl.u32 %v69_v0, 7  ;;  %v98_v8 = vsel %vm96_vm1, 65537, %v473_v7  ;;  %v439_v21 = vld [vmem:[#allocation2 + $0x10] sm:$0xff]   ;;  %v440_v25 = vld [vmem:[#allocation2 + $0x18] sm:$0xff]   ;;  %v441_v38 = vld [vmem:[#allocation2 + $0x20] sm:$0xff]  }
  0x20   :  { %v115_v9 = vpack.i.b16 %v114_v3, %v114_v3  ;;  %v155_v15 = vpack.i.b16 %v154_v5, %v154_v5  ;;  %v442_v39 = vld [vmem:[#allocation2 + $0x28] sm:$0xff]   ;;  %v443_v48 = vld [vmem:[#allocation2 + $0x30] sm:$0xff]   ;;  %v444_v61 = vld [vmem:[#allocation2 + $0x38] sm:$0xff]  }
  0x21   :  { %vm74_vm2 = vcmp.eq.s32.totalorder %v70_v4, 1  ;;  %vm76_vm3 = vcmp.eq.s32.totalorder %v70_v4, 2  ;;  %vm78_vm4 = vcmp.eq.s32.totalorder %v70_v4, 3  ;;  %vm80_vm5 = vcmp.eq.s32.totalorder %v70_v4, 4 }
  0x22   :  { %v93_v13 = vsub.s32 0, %v70_v4  ;;  %vm95_vm6 = vmpackc.low %vm74_vm2, %vm74_vm2  ;;  %v139_v14 = vsub.s32 1, %v70_v4 }
  0x23   :  { %v97_v16 = vsel %vm95_vm6, 65537, %v473_v7  ;;  %vm121_vm7 = vmpackc.low %vm76_vm3, %vm76_vm3 }
  0x24   :  { %v515_v17 = vrot.slane %v89_v6, %v93_v13  ;;  %v389_v18 = vcombine.low %v97_v16, %v98_v8  ;;  %v517_v19 = vrot.slane %v115_v9, %v93_v13  ;;  %v123_v20 = vsel %vm121_vm7, 65537, %v473_v7  ;;  %vm141_vm8 = vmpackc.low %vm78_vm4, %vm78_vm4 }
  0x25   :  { %v391_v22 = vcombine.low %v123_v20, %v98_v8  ;;  %v519_v23 = vrot.slane %v135_v10, %v139_v14  ;;  %v143_v24 = vsel %vm141_vm8, 65537, %v473_v7  ;;  %vm161_vm9 = vmpackc.low %vm80_vm5, %vm80_vm5  ;;  %v527_v28 = vrot.slane %v155_v15, %v139_v14 }
  0x26   :  { %vm523_vm10 = vcmp.ne.s16.totalorder %v389_v18, 0  ;;  %v392_v27 = vcombine.low %v143_v24, %v98_v8  ;;  %v163_v29 = vsel %vm161_vm9, 65537, %v473_v7 }
  0x27   :  { %v109_v30 = vsel %vm523_vm10, %v515_v17, %v437_v11  ;;  %vm532_vm11 = vcmp.ne.s16.totalorder %v391_v22, 0  ;;  %v393_v32 = vcombine.low %v163_v29, %v98_v8  ;;  %v188_v33 = vsel %vm523_vm10, %v515_v17, %v438_v12 }
  0x28   :  { %v129_v34 = vsel %vm532_vm11, %v517_v19, %v109_v30  ;;  %vm542_vm12 = vcmp.ne.s16.totalorder %v392_v27, 0  ;;  %v189_v36 = vsel %vm532_vm11, %v517_v19, %v188_v33  ;;  %v211_v37 = vsel %vm523_vm10, %v515_v17, %v439_v21 }
  0x29   :  { %v149_v40 = vsel %vm542_vm12, %v519_v23, %v129_v34  ;;  %vm555_vm13 = vcmp.ne.s16.totalorder %v393_v32, 0  ;;  %v190_v42 = vsel %vm542_vm12, %v519_v23, %v189_v36  ;;  %v212_v43 = vsel %vm532_vm11, %v517_v19, %v211_v37 }
  0x2a   :  { %v169_v44 = vsel %vm555_vm13, %v527_v28, %v149_v40  ;;  %v191_v45 = vsel %vm555_vm13, %v527_v28, %v190_v42  ;;  %v213_v46 = vsel %vm542_vm12, %v519_v23, %v212_v43  ;;  %v234_v47 = vsel %vm523_vm10, %v515_v17, %v440_v25 }
  0x2b   :  { %v394_v49 = vcombine.low %v169_v44, %v169_v44  ;;  %v395_v50 = vcombine.high %v169_v44, %v169_v44  ;;  %v397_v51 = vcombine.low %v191_v45, %v191_v45  ;;  %v398_v52 = vcombine.high %v191_v45, %v191_v45 }
  0x2c   :  { %v214_v53 = vsel %vm555_vm13, %v527_v28, %v213_v46  ;;  %v235_v54 = vsel %vm532_vm11, %v517_v19, %v234_v47  ;;  %v257_v55 = vsel %vm523_vm10, %v515_v17, %v441_v38  ;;  %v280_v56 = vsel %vm523_vm10, %v515_v17, %v442_v39 }
  0x2d   :  { %177 = vst [vmem:[#allocation7] sm:$0xf] %v394_v49  ;;  %178 = vst [vmem:[#allocation7 + $0x4] sm:$0xf] %v395_v50  ;;  %v400_v57 = vcombine.low %v214_v53, %v214_v53  ;;  %v401_v58 = vcombine.high %v214_v53, %v214_v53  ;;  %v236_v59 = vsel %vm542_vm12, %v519_v23, %v235_v54 }
  0x2e   :  { %200 = vst [vmem:[#allocation7 + $0x8] sm:$0xf] %v397_v51  ;;  %201 = vst [vmem:[#allocation7 + $0xc] sm:$0xf] %v398_v52  ;;  %v258_v60 = vsel %vm532_vm11, %v517_v19, %v257_v55  ;;  %v237_v62 = vsel %vm555_vm13, %v527_v28, %v236_v59  ;;  %v281_v0 = vsel %vm532_vm11, %v517_v19, %v280_v56 }
  0x2f   :  { %v259_v63 = vsel %vm542_vm12, %v519_v23, %v258_v60  ;;  %v303_v1 = vsel %vm523_vm10, %v515_v17, %v443_v48  ;;  %223 = vst [vmem:[#allocation7 + $0x10] sm:$0xf] %v400_v57  ;;  %224 = vst [vmem:[#allocation7 + $0x14] sm:$0xf] %v401_v58  ;;  %v403_v2 = vcombine.low %v237_v62, %v237_v62 }
  0x30   :  { %v404_v3 = vcombine.high %v237_v62, %v237_v62  ;;  %v260_v4 = vsel %vm555_vm13, %v527_v28, %v259_v63  ;;  %v282_v5 = vsel %vm542_vm12, %v519_v23, %v281_v0  ;;  %v304_v9 = vsel %vm532_vm11, %v517_v19, %v303_v1 }
  0x31   :  { %v406_v6 = vcombine.low %v260_v4, %v260_v4  ;;  %v407_v7 = vcombine.high %v260_v4, %v260_v4  ;;  %v283_v8 = vsel %vm555_vm13, %v527_v28, %v282_v5  ;;  %246 = vst [vmem:[#allocation7 + $0x18] sm:$0xf] %v403_v2  ;;  %v305_v12 = vsel %vm542_vm12, %v519_v23, %v304_v9 }
  0x32   :  { %247 = vst [vmem:[#allocation7 + $0x1c] sm:$0xf] %v404_v3  ;;  %v409_v10 = vcombine.low %v283_v8, %v283_v8  ;;  %v410_v11 = vcombine.high %v283_v8, %v283_v8  ;;  %v326_v13 = vsel %vm523_vm10, %v515_v17, %v444_v61  ;;  %v306_v14 = vsel %vm555_vm13, %v527_v28, %v305_v12 }
  0x33   :  { %269 = vst [vmem:[#allocation7 + $0x20] sm:$0xf] %v406_v6  ;;  %270 = vst [vmem:[#allocation7 + $0x24] sm:$0xf] %v407_v7  ;;  %v327_v15 = vsel %vm532_vm11, %v517_v19, %v326_v13  ;;  %v412_v16 = vcombine.low %v306_v14, %v306_v14  ;;  %v413_v18 = vcombine.high %v306_v14, %v306_v14 }
  0x34   :  { %292 = vst [vmem:[#allocation7 + $0x28] sm:$0xf] %v409_v10  ;;  %293 = vst [vmem:[#allocation7 + $0x2c] sm:$0xf] %v410_v11  ;;  %v328_v20 = vsel %vm542_vm12, %v519_v23, %v327_v15 }
  0x35   :  { %v329_v17 = vsel %vm555_vm13, %v527_v28, %v328_v20  ;;  %315 = vst [vmem:[#allocation7 + $0x30] sm:$0xf] %v412_v16  ;;  %316 = vst [vmem:[#allocation7 + $0x34] sm:$0xf] %v413_v18 }
  0x36   :  { %v415_v21 = vcombine.low %v329_v17, %v329_v17  ;;  %v416_v22 = vcombine.high %v329_v17, %v329_v17 }
  0x38   :  { %338 = vst [vmem:[#allocation7 + $0x38] sm:$0xf] %v415_v21  ;;  %339 = vst [vmem:[#allocation7 + $0x3c] sm:$0xf] %v416_v22 }
  0x39   :  { %s474_s2 = smov [#allocation7]   ;;  %s475_s7 = smov 128  }
  0x3a   :  { %s361_s6 = sshll.u32 %s474_s2, 4  ;;  %368 = sst [smem:[#allocation11]] %s475_s7  ;;  %s362_s6 = int_to_ptr.vmem [resolvable:$true] %s361_s6 }
  0x3b   :  { %s476_s8 = smov 256   ;;  %s477_s9 = smov 2  }
  0x3c   :  { %370 = sst [smem:[#allocation11 + $0x1]] %s476_s8  ;;  %s478_s10 = smov 64  }
  0x3d   :  { %372 = sst [smem:[#allocation11 + $0x2]] %s477_s9  ;;  %s479_s11 = smov 4  }
  0x3e   :  { %374 = sst [smem:[#allocation11 + $0x3]] %s478_s10  ;;  %s480_s12 = smov [#allocation4]  }
  0x3f   :  { %376 = sst [smem:[#allocation11 + $0x4]] %s478_s10  ;;  %s481_s13 = smov [#allocation10]  }
  0x40   :  { %378 = sst [smem:[#allocation11 + $0x5]] %s479_s11  ;;  %s482_s14 = smov 0  }
  0x41   :  { %380 = dma.general %s362_s6, 1024, %s643_s3, %s480_s12, %s481_s13, [#allocation11], %s482_s14, 0  }
  0x42   :  { %461 = dma.done.wait [#allocation4], 1024  }
  0x43   :  { %462 = vsyncadd [#allocation4], 4294966272 }
  0x44   :  { %384 = vsyncpa [#allocation3], 1 }
  0x45   :  { %385 = vsyncpa [#allocation4], 1 }
  0x46   :  { %386 = vsyncpa [#allocation5], 1 }

// kernel: _forward_impl.3
= control target key start
LH: loop header
LB: loop body
LE: loop exit
PB: predicated region body
PF: predicated region fallthrough
CT: control target
= control target key end

     0   :  { %s1391_s0 = inlined_call_operand.vmem [shape: bf16[8,32,128], index: 0, kind: input, shape index: {}, may-alias: {0,4}]   ;;  %s1392_s1 = inlined_call_operand.vmem [shape: s32[8], index: 1, kind: input, shape index: {}]   ;;  %s1393_s2 = inlined_call_operand.vmem [shape: bf16[1,128], index: 2, kind: input, shape index: {}]   ;;  %s1394_s3 = inlined_call_operand.vmem [shape: bf16[3,128], index: 3, kind: input, shape index: {}]   ;;  %s1395_s4 = inlined_call_operand.vmem [shape: bf16[8,32,128], index: 4, kind: output, shape index: {}, may-alias: {0,4}]  }
   0x1   :  { %v27_v0 = vld [vmem:[%s1391_s0] sm:$0xff]   ;;  %v31_v1 = vld [vmem:[%s1391_s0 + $0x10] sm:$0xff]   ;;  %s117_s23 = sshll.u32 %s1392_s1, 4  ;;  %s118_s23 = int_to_ptr.vmem [resolvable:$true] %s117_s23 }
   0x2   :  { %v35_v2 = vld [vmem:[%s1391_s0 + $0x20] sm:$0xff]   ;;  %28 = vst [vmem:[#allocation2] sm:$0xff] %v27_v0   ;;  %32 = vst [vmem:[#allocation2 + $0x8] sm:$0xff] %v31_v1   ;;  %v39_v3 = vld [vmem:[%s1391_s0 + $0x30] sm:$0xff]  }
   0x3   :  { %36 = vst [vmem:[#allocation2 + $0x10] sm:$0xff] %v35_v2   ;;  %v43_v4 = vld [vmem:[%s1391_s0 + $0x40] sm:$0xff]   ;;  %v47_v5 = vld [vmem:[%s1391_s0 + $0x50] sm:$0xff]   ;;  %40 = vst [vmem:[#allocation2 + $0x18] sm:$0xff] %v39_v3  }
   0x4   :  { %44 = vst [vmem:[#allocation2 + $0x20] sm:$0xff] %v43_v4   ;;  %48 = vst [vmem:[#allocation2 + $0x28] sm:$0xff] %v47_v5   ;;  %v51_v6 = vld [vmem:[%s1391_s0 + $0x60] sm:$0xff]   ;;  %v55_v7 = vld [vmem:[%s1391_s0 + $0x70] sm:$0xff]  }
   0x5   :  { %9 = vsyncpa [#allocation4], 0  ;;  %52 = vst [vmem:[#allocation2 + $0x30] sm:$0xff] %v51_v6   ;;  %s942_s7 = scalar_lea.vmem %s118_s23, 16  ;;  %p947_p1 = scmp.lt.s32.totalorder %s118_s23, %s118_s23 }
   0x6   :  { %56 = vst [vmem:[#allocation2 + $0x38] sm:$0xff] %v55_v7   ;;  %p943_p0 = scmp.ne.s32.totalorder %s118_s23, %s942_s7  ;;  %p948_p2 = scmp.lt.s32.totalorder %s942_s7, %s942_s7 }
   0x8   :  { %p949_p3 = por %p948_p2, %p947_p1 }
   0xa   :  { %p950_p4 = pnand %p949_p3, %p943_p0 }
   0xc   :  { %953 = shalt.err (!%p950_p4)
}
   0xd   :  { %s956_s8 = smov [#allocation3]  }
   0xe   :  { %120 = dma.vmem_to_smem %s118_s23, 16, %s956_s8, [#allocation4]  }
   0xf   :  { %954 = dma.done.wait [#allocation4], 16  }
  0x10   :  { %955 = vsyncadd [#allocation4], 4294967280 }
  0x11   :  { %130 = sfence }
  0x12   :  { %v134_v8 = vlaneseq  ;;  %v137_v9 = vld [vmem:[%s1393_s2] sm:$0x1]  ;;  %v139_v12 = vld [vmem:[%s1394_s3] sm:$0x2]  ;;  %vm957_vm0 = vmmov 0   ;;  %s1022_s14 = sld [smem:[#allocation3]] }
  0x13   :  { %v138_v10 = vld [vmem:[%s1394_s3] sm:$0x1]  ;;  %v149_v13 = vpack.i.b16 %v137_v9, %v137_v9  ;;  %vm156_vm1 = vmpackc.low %vm957_vm0, %vm957_vm0  ;;  %v958_v17 = vmov 0   ;;  %s1029_s2 = sld [smem:[#allocation3 + $0x1]]  ;;  %v228_v21 = vpack.i.b16 %v139_v12, %v139_v12  ;;  %s1038_s3 = sld [smem:[#allocation3 + $0x2]]  ;;  %v1040_v27 = vld [vmem:[#allocation2 + $0x8] sm:$0xff]  }
  0x14   :  { %v1017_v11 = vshrl.u32 %v134_v8, 7  ;;  %v203_v14 = vshrl.u32 %v138_v10, 16  ;;  %v180_v15 = vpack.i.b16 %v138_v10, %v138_v10  ;;  %v158_v18 = vsel %vm156_vm1, 65537, %v958_v17  ;;  %v1027_v19 = vld [vmem:[#allocation2] sm:$0xff]   ;;  %v1070_v38 = vld [vmem:[#allocation2 + $0x10] sm:$0xff]   ;;  %s1082_s22 = sld [smem:[#allocation3 + $0x3]] }
  0x15   :  { %v1130_v58 = vld [vmem:[#allocation2 + $0x18] sm:$0xff]   ;;  %s1144_s26 = sld [smem:[#allocation3 + $0x4]]  ;;  %s1220_s1 = sld [smem:[#allocation3 + $0x5]] }
  0x16   :  { %vm140_vm2 = vcmp.eq.s32.totalorder %v1017_v11, 1  ;;  %v153_v16 = vsub.s32 0, %v1017_v11  ;;  %v204_v20 = vpack.i.b16 %v203_v14, %v203_v14  ;;  %v232_v22 = vsub.s32 1, %v1017_v11  ;;  %s1261_s8 = sld [smem:[#allocation3 + $0x6]]  ;;  %s1297_s13 = sld [smem:[#allocation3 + $0x7]] }
  0x17   :  { %vm155_vm3 = vmpackc.low %vm140_vm2, %vm140_vm2  ;;  %v1033_v23 = vadd.s32 8, %v1017_v11 }
  0x18   :  { %v1035_v24 = vrot.slane %v149_v13, %v153_v16  ;;  %v157_v25 = vsel %vm155_vm3, 65537, %v958_v17  ;;  %s171_s15 = sadd.s32 2, %s1022_s14  ;;  %v1043_v28 = vrot.slane %v180_v15, %v153_v16  ;;  %s195_s16 = sadd.s32 3, %s1022_s14  ;;  %v1046_v29 = vrot.slane %v204_v20, %v153_v16  ;;  %v1194_v20 = vld [vmem:[#allocation2 + $0x20] sm:$0xff]  }
  0x19   :  { %v875_v26 = vcombine.low %v157_v25, %v158_v18  ;;  %v172_v31 = vstv %s171_s15  ;;  %v196_v32 = vstv %s195_s16  ;;  %s219_s17 = sadd.s32 4, %s1022_s14  ;;  %v1053_v33 = vrot.slane %v228_v21, %v232_v22  ;;  %s264_s18 = sadd.s32 2, %s1029_s2 }
  0x1a   :  { %vm173_vm5 = vcmp.eq.s32.totalorder %v1017_v11, %v172_v31  ;;  %vm174_vm6 = vcmp.eq.s32.totalorder %v1033_v23, %v172_v31  ;;  %vm197_vm7 = vcmp.eq.s32.totalorder %v1017_v11, %v196_v32  ;;  %s281_s19 = sadd.s32 3, %s1029_s2  ;;  %vm198_vm9 = vcmp.eq.s32.totalorder %v1033_v23, %v196_v32  ;;  %s298_s20 = sadd.s32 4, %s1029_s2 }
  0x1b   :  { %vm1048_vm4 = vcmp.ne.s16.totalorder %v875_v26, 0  ;;  %vm186_vm8 = vmpackc.low %vm173_vm5, %vm173_vm5  ;;  %v220_v35 = vstv %s219_s17  ;;  %v265_v37 = vstv %s264_s18  ;;  %v282_v41 = vstv %s281_s19  ;;  %s337_s21 = sadd.s32 2, %s1038_s3  ;;  %s354_s23 = sadd.s32 3, %s1038_s3 }
  0x1c   :  { %v169_v34 = vsel %vm1048_vm4, %v1035_v24, %v1027_v19  ;;  %v261_v36 = vsel %vm1048_vm4, %v1035_v24, %v1040_v27  ;;  %vm187_vm10 = vmpackc.low %vm174_vm6, %vm174_vm6  ;;  %v188_v39 = vsel %vm186_vm8, 65537, %v958_v17  ;;  %vm221_vm11 = vcmp.eq.s32.totalorder %v1017_v11, %v220_v35  ;;  %s371_s24 = sadd.s32 4, %s1038_s3  ;;  %s410_s25 = sadd.s32 2, %s1082_s22 }
  0x1d   :  { %vm222_vm12 = vcmp.eq.s32.totalorder %v1033_v23, %v220_v35  ;;  %vm266_vm13 = vcmp.eq.s32.totalorder %v1017_v11, %v265_v37  ;;  %v189_v40 = vsel %vm187_vm10, 65537, %v958_v17  ;;  %vm210_vm14 = vmpackc.low %vm197_vm7, %vm197_vm7  ;;  %vm267_vm15 = vcmp.eq.s32.totalorder %v1033_v23, %v265_v37  ;;  %s427_s27 = sadd.s32 3, %s1082_s22  ;;  %s444_s28 = sadd.s32 4, %s1082_s22 }
  0x1e   :  { %v299_v42 = vstv %s298_s20  ;;  %v877_v43 = vcombine.low %v188_v39, %v189_v40  ;;  %vm211_vm0 = vmpackc.low %vm198_vm9, %vm198_vm9  ;;  %v212_v44 = vsel %vm210_vm14, 65537, %v958_v17  ;;  %vm283_vm1 = vcmp.eq.s32.totalorder %v1017_v11, %v282_v41  ;;  %s483_s29 = sadd.s32 2, %s1144_s26  ;;  %s500_s30 = sadd.s32 3, %s1144_s26 }
  0x1f   :  { %vm284_vm2 = vcmp.eq.s32.totalorder %v1033_v23, %v282_v41  ;;  %v213_v45 = vsel %vm211_vm0, 65537, %v958_v17  ;;  %vm234_vm3 = vmpackc.low %vm221_vm11, %vm221_vm11  ;;  %vm300_vm5 = vcmp.eq.s32.totalorder %v1017_v11, %v299_v42  ;;  %vm301_vm6 = vcmp.eq.s32.totalorder %v1033_v23, %v299_v42  ;;  %s517_s7 = sadd.s32 4, %s1144_s26  ;;  %s556_s9 = sadd.s32 2, %s1220_s1 }
  0x20   :  { %v334_v46 = vsel %vm1048_vm4, %v1035_v24, %v1070_v38  ;;  %vm193_vm7 = vcmp.ne.s16.totalorder %v877_v43, 0  ;;  %v878_v47 = vcombine.low %v212_v44, %v213_v45  ;;  %vm235_vm8 = vmpackc.low %vm222_vm12, %vm222_vm12  ;;  %v236_v48 = vsel %vm234_vm3, 65537, %v958_v17  ;;  %s573_s11 = sadd.s32 3, %s1220_s1  ;;  %s590_s12 = sadd.s32 4, %s1220_s1 }
  0x21   :  { %v338_v49 = vstv %s337_s21  ;;  %v194_v50 = vsel %vm193_vm7, %v1043_v28, %v169_v34  ;;  %v237_v51 = vsel %vm235_vm8, 65537, %v958_v17  ;;  %vm272_vm9 = vmpackc.low %vm266_vm13, %vm266_vm13  ;;  %v355_v55 = vstv %s354_s23  ;;  %s629_s14 = sadd.s32 2, %s1261_s8  ;;  %s646_s2 = sadd.s32 3, %s1261_s8 }
  0x22   :  { %vm339_vm10 = vcmp.eq.s32.totalorder %v1017_v11, %v338_v49  ;;  %vm340_vm11 = vcmp.eq.s32.totalorder %v1033_v23, %v338_v49  ;;  %vm1113_vm14 = vcmp.ne.s16.totalorder %v878_v47, 0  ;;  %v879_v53 = vcombine.low %v236_v48, %v237_v51  ;;  %vm273_vm12 = vmpackc.low %vm267_vm15, %vm267_vm15  ;;  %s663_s3 = sadd.s32 4, %s1261_s8  ;;  %s702_s17 = sadd.s32 2, %s1297_s13 }
  0x23   :  { %v274_v54 = vsel %vm272_vm9, 65537, %v958_v17  ;;  %v218_v56 = vsel %vm1113_vm14, %v1046_v29, %v194_v50  ;;  %v275_v57 = vsel %vm273_vm12, 65537, %v958_v17  ;;  %vm289_vm13 = vmpackc.low %vm283_vm1, %vm283_vm1  ;;  %vm356_vm0 = vcmp.eq.s32.totalorder %v1017_v11, %v355_v55  ;;  %s719_s18 = sadd.s32 3, %s1297_s13  ;;  %s736_s21 = sadd.s32 4, %s1297_s13 }
  0x24   :  { %vm357_vm3 = vcmp.eq.s32.totalorder %v1033_v23, %v355_v55  ;;  %vm241_vm15 = vcmp.ne.s16.totalorder %v879_v53, 0  ;;  %v884_v59 = vcombine.low %v274_v54, %v275_v57  ;;  %vm290_vm7 = vmpackc.low %vm284_vm2, %vm284_vm2  ;;  %v291_v60 = vsel %vm289_vm13, 65537, %v958_v17 }
  0x25   :  { %v372_v61 = vstv %s371_s24  ;;  %v242_v62 = vsel %vm241_vm15, %v1053_v33, %v218_v56  ;;  %v292_v63 = vsel %vm290_vm7, 65537, %v958_v17  ;;  %vm306_vm1 = vmpackc.low %vm300_vm5, %vm300_vm5  ;;  %v407_v6 = vsel %vm1048_vm4, %v1035_v24, %v1130_v58 }
  0x26   :  { %vm373_vm8 = vcmp.eq.s32.totalorder %v1017_v11, %v372_v61  ;;  %vm374_vm9 = vcmp.eq.s32.totalorder %v1033_v23, %v372_v61  ;;  %v880_v0 = vcombine.low %v242_v62, %v242_v62  ;;  %v881_v1 = vcombine.high %v242_v62, %v242_v62  ;;  %vm307_vm14 = vmpackc.low %vm301_vm6, %vm301_vm6 }
  0x27   :  { %vm279_vm2 = vcmp.ne.s16.totalorder %v884_v59, 0  ;;  %v885_v2 = vcombine.low %v291_v60, %v292_v63  ;;  %v308_v4 = vsel %vm306_vm1, 65537, %v958_v17  ;;  %v309_v5 = vsel %vm307_vm14, 65537, %v958_v17  ;;  %vm345_vm5 = vmpackc.low %vm339_vm10, %vm339_vm10 }
  0x28   :  { %v280_v3 = vsel %vm279_vm2, %v1043_v28, %v261_v36  ;;  %250 = vst [vmem:[#allocation5] sm:$0xf] %v880_v0  ;;  %251 = vst [vmem:[#allocation5 + $0x4] sm:$0xf] %v881_v1  ;;  %v886_v8 = vcombine.low %v308_v4, %v309_v5  ;;  %v347_v9 = vsel %vm345_vm5, 65537, %v958_v17  ;;  %v411_v10 = vstv %s410_s25  ;;  %v939_v0 = vld [vmem:[#allocation2 + $0x28] sm:$0xff]  }
  0x29   :  { %vm1165_vm6 = vcmp.ne.s16.totalorder %v885_v2, 0  ;;  %vm346_vm12 = vmpackc.low %vm340_vm11, %vm340_vm11  ;;  %vm412_vm13 = vcmp.eq.s32.totalorder %v1017_v11, %v411_v10  ;;  %vm413_vm15 = vcmp.eq.s32.totalorder %v1033_v23, %v411_v10  ;;  %v428_v16 = vstv %s427_s27 }
  0x2a   :  { %v297_v12 = vsel %vm1165_vm6, %v1046_v29, %v280_v3  ;;  %v348_v13 = vsel %vm346_vm12, 65537, %v958_v17  ;;  %vm362_vm10 = vmpackc.low %vm356_vm0, %vm356_vm0  ;;  %vm313_vm7 = vcmp.ne.s16.totalorder %v886_v8, 0  ;;  %vm429_vm1 = vcmp.eq.s32.totalorder %v1017_v11, %v428_v16 }
  0x2b   :  { %v891_v14 = vcombine.low %v347_v9, %v348_v13  ;;  %vm363_vm11 = vmpackc.low %vm357_vm3, %vm357_vm3  ;;  %v364_v15 = vsel %vm362_vm10, 65537, %v958_v17  ;;  %v314_v18 = vsel %vm313_vm7, %v1053_v33, %v297_v12  ;;  %vm430_vm2 = vcmp.eq.s32.totalorder %v1033_v23, %v428_v16 }
  0x2c   :  { %v365_v19 = vsel %vm363_vm11, 65537, %v958_v17  ;;  %vm379_vm0 = vmpackc.low %vm373_vm8, %vm373_vm8  ;;  %v887_v21 = vcombine.low %v314_v18, %v314_v18  ;;  %v888_v22 = vcombine.high %v314_v18, %v314_v18  ;;  %v445_v32 = vstv %s444_s28 }
  0x2d   :  { %vm352_vm3 = vcmp.ne.s16.totalorder %v891_v14, 0  ;;  %v892_v25 = vcombine.low %v364_v15, %v365_v19  ;;  %vm380_vm14 = vmpackc.low %vm374_vm9, %vm374_vm9  ;;  %v381_v27 = vsel %vm379_vm0, 65537, %v958_v17  ;;  %vm446_vm6 = vcmp.eq.s32.totalorder %v1017_v11, %v445_v32 }
  0x2e   :  { %v353_v26 = vsel %vm352_vm3, %v1043_v28, %v334_v46  ;;  %v382_v31 = vsel %vm380_vm14, 65537, %v958_v17  ;;  %vm418_vm8 = vmpackc.low %vm412_vm13, %vm412_vm13  ;;  %323 = vst [vmem:[#allocation5 + $0x8] sm:$0xf] %v887_v21  ;;  %vm447_vm10 = vcmp.eq.s32.totalorder %v1033_v23, %v445_v32  ;;  %v480_v39 = vsel %vm1048_vm4, %v1035_v24, %v1194_v20 }
  0x2f   :  { %324 = vst [vmem:[#allocation5 + $0xc] sm:$0xf] %v888_v22  ;;  %vm1211_vm9 = vcmp.ne.s16.totalorder %v892_v25, 0  ;;  %v893_v35 = vcombine.low %v381_v27, %v382_v31  ;;  %vm419_vm5 = vmpackc.low %vm413_vm15, %vm413_vm15  ;;  %v420_v36 = vsel %vm418_vm8, 65537, %v958_v17  ;;  %v780_v40 = vld [vmem:[#allocation5] sm:$0xff]   ;;  %v484_v43 = vstv %s483_s29 }
  0x30   :  { %v370_v37 = vsel %vm1211_vm9, %v1046_v29, %v353_v26  ;;  %v421_v38 = vsel %vm419_vm5, 65537, %v958_v17  ;;  %vm435_vm12 = vmpackc.low %vm429_vm1, %vm429_vm1  ;;  %781 = vst [vmem:[%s1395_s4] sm:$0xff] %v780_v40   ;;  %vm485_vm11 = vcmp.eq.s32.totalorder %v1017_v11, %v484_v43  ;;  %vm486_vm0 = vcmp.eq.s32.totalorder %v1033_v23, %v484_v43 }
  0x31   :  { %vm386_vm13 = vcmp.ne.s16.totalorder %v893_v35, 0  ;;  %v898_v41 = vcombine.low %v420_v36, %v421_v38  ;;  %vm436_vm15 = vmpackc.low %vm430_vm2, %vm430_vm2  ;;  %v437_v42 = vsel %vm435_vm12, 65537, %v958_v17  ;;  %v501_v52 = vstv %s500_s30  ;;  %v940_v36 = vld [vmem:[#allocation2 + $0x30] sm:$0xff]  }
  0x32   :  { %v387_v44 = vsel %vm386_vm13, %v1053_v33, %v370_v37  ;;  %v438_v45 = vsel %vm436_vm15, 65537, %v958_v17  ;;  %vm452_vm7 = vmpackc.low %vm446_vm6, %vm446_vm6  ;;  %vm502_vm9 = vcmp.eq.s32.totalorder %v1017_v11, %v501_v52  ;;  %vm503_vm5 = vcmp.eq.s32.totalorder %v1033_v23, %v501_v52 }
  0x33   :  { %v894_v46 = vcombine.low %v387_v44, %v387_v44  ;;  %v895_v47 = vcombine.high %v387_v44, %v387_v44  ;;  %vm425_vm1 = vcmp.ne.s16.totalorder %v898_v41, 0  ;;  %v899_v48 = vcombine.low %v437_v42, %v438_v45  ;;  %vm453_vm2 = vmpackc.low %vm447_vm10, %vm447_vm10 }
  0x34   :  { %v426_v49 = vsel %vm425_vm1, %v1043_v28, %v407_v6  ;;  %v454_v50 = vsel %vm452_vm7, 65537, %v958_v17  ;;  %v455_v51 = vsel %vm453_vm2, 65537, %v958_v17  ;;  %vm491_vm3 = vmpackc.low %vm485_vm11, %vm485_vm11  ;;  %v518_v58 = vstv %s517_s7 }
  0x35   :  { %396 = vst [vmem:[#allocation5 + $0x10] sm:$0xf] %v894_v46  ;;  %397 = vst [vmem:[#allocation5 + $0x14] sm:$0xf] %v895_v47  ;;  %vm1263_vm14 = vcmp.ne.s16.totalorder %v899_v48, 0  ;;  %v900_v54 = vcombine.low %v454_v50, %v455_v51  ;;  %v493_v55 = vsel %vm491_vm3, 65537, %v958_v17  ;;  %vm519_vm13 = vcmp.eq.s32.totalorder %v1017_v11, %v518_v58 }
  0x36   :  { %vm492_vm8 = vmpackc.low %vm486_vm0, %vm486_vm0  ;;  %v443_v56 = vsel %vm1263_vm14, %v1046_v29, %v426_v49  ;;  %v784_v59 = vld [vmem:[#allocation5 + $0x8] sm:$0xff]   ;;  %vm520_vm15 = vcmp.eq.s32.totalorder %v1033_v23, %v518_v58  ;;  %v557_v7 = vstv %s556_s9  ;;  %v553_v12 = vsel %vm1048_vm4, %v1035_v24, %v939_v0  ;;  %v941_v58 = vld [vmem:[#allocation2 + $0x38] sm:$0xff]  }
  0x37   :  { %v494_v57 = vsel %vm492_vm8, 65537, %v958_v17  ;;  %vm508_vm6 = vmpackc.low %vm502_vm9, %vm502_vm9  ;;  %vm459_vm12 = vcmp.ne.s16.totalorder %v900_v54, 0  ;;  %785 = vst [vmem:[%s1395_s4 + $0x10] sm:$0xff] %v784_v59   ;;  %vm558_vm2 = vcmp.eq.s32.totalorder %v1017_v11, %v557_v7  ;;  %vm559_vm3 = vcmp.eq.s32.totalorder %v1033_v23, %v557_v7 }
  0x38   :  { %v905_v60 = vcombine.low %v493_v55, %v494_v57  ;;  %vm509_vm10 = vmpackc.low %vm503_vm5, %vm503_vm5  ;;  %v510_v61 = vsel %vm508_vm6, 65537, %v958_v17  ;;  %v460_v62 = vsel %vm459_vm12, %v1053_v33, %v443_v56  ;;  %v574_v13 = vstv %s573_s11 }
  0x39   :  { %v511_v63 = vsel %vm509_vm10, 65537, %v958_v17  ;;  %vm525_vm7 = vmpackc.low %vm519_vm13, %vm519_vm13  ;;  %v901_v1 = vcombine.low %v460_v62, %v460_v62  ;;  %v902_v2 = vcombine.high %v460_v62, %v460_v62  ;;  %v591_v14 = vstv %s590_s12 }
  0x3a   :  { %vm498_vm11 = vcmp.ne.s16.totalorder %v905_v60, 0  ;;  %v906_v3 = vcombine.low %v510_v61, %v511_v63  ;;  %vm526_vm0 = vmpackc.low %vm520_vm15, %vm520_vm15  ;;  %v527_v5 = vsel %vm525_vm7, 65537, %v958_v17  ;;  %vm575_vm5 = vcmp.eq.s32.totalorder %v1017_v11, %v574_v13 }
  0x3b   :  { %v499_v4 = vsel %vm498_vm11, %v1043_v28, %v480_v39  ;;  %v528_v6 = vsel %vm526_vm0, 65537, %v958_v17  ;;  %469 = vst [vmem:[#allocation5 + $0x18] sm:$0xf] %v901_v1  ;;  %470 = vst [vmem:[#allocation5 + $0x1c] sm:$0xf] %v902_v2  ;;  %vm576_vm6 = vcmp.eq.s32.totalorder %v1033_v23, %v574_v13  ;;  %vm592_vm10 = vcmp.eq.s32.totalorder %v1017_v11, %v591_v14 }
  0x3c   :  { %vm1291_vm1 = vcmp.ne.s16.totalorder %v906_v3, 0  ;;  %v907_v9 = vcombine.low %v527_v5, %v528_v6  ;;  %vm564_vm14 = vmpackc.low %vm558_vm2, %vm558_vm2  ;;  %v788_v15 = vld [vmem:[#allocation5 + $0x10] sm:$0xff]   ;;  %vm593_vm13 = vcmp.eq.s32.totalorder %v1033_v23, %v591_v14  ;;  %v630_v27 = vstv %s629_s14 }
  0x3d   :  { %v516_v10 = vsel %vm1291_vm1, %v1046_v29, %v499_v4  ;;  %vm565_vm9 = vmpackc.low %vm559_vm3, %vm559_vm3  ;;  %v566_v16 = vsel %vm564_vm14, 65537, %v958_v17  ;;  %789 = vst [vmem:[%s1395_s4 + $0x20] sm:$0xff] %v788_v15   ;;  %v647_v31 = vstv %s646_s2  ;;  %v664_v32 = vstv %s663_s3 }
  0x3e   :  { %vm532_vm8 = vcmp.ne.s16.totalorder %v907_v9, 0  ;;  %v567_v19 = vsel %vm565_vm9, 65537, %v958_v17  ;;  %vm581_vm12 = vmpackc.low %vm575_vm5, %vm575_vm5  ;;  %vm631_vm1 = vcmp.eq.s32.totalorder %v1017_v11, %v630_v27  ;;  %vm632_vm2 = vcmp.eq.s32.totalorder %v1033_v23, %v630_v27 }
  0x3f   :  { %v533_v18 = vsel %vm532_vm8, %v1053_v33, %v516_v10  ;;  %v912_v22 = vcombine.low %v566_v16, %v567_v19  ;;  %vm582_vm15 = vmpackc.low %vm576_vm6, %vm576_vm6  ;;  %v583_v25 = vsel %vm581_vm12, 65537, %v958_v17  ;;  %vm648_vm14 = vcmp.eq.s32.totalorder %v1017_v11, %v647_v31 }
  0x40   :  { %v908_v20 = vcombine.low %v533_v18, %v533_v18  ;;  %v909_v21 = vcombine.high %v533_v18, %v533_v18  ;;  %v584_v26 = vsel %vm582_vm15, 65537, %v958_v17  ;;  %vm598_vm7 = vmpackc.low %vm592_vm10, %vm592_vm10  ;;  %vm649_vm5 = vcmp.eq.s32.totalorder %v1033_v23, %v647_v31 }
  0x41   :  { %vm571_vm11 = vcmp.ne.s16.totalorder %v912_v22, 0  ;;  %v913_v34 = vcombine.low %v583_v25, %v584_v26  ;;  %vm599_vm0 = vmpackc.low %vm593_vm13, %vm593_vm13  ;;  %v600_v35 = vsel %vm598_vm7, 65537, %v958_v17  ;;  %vm665_vm12 = vcmp.eq.s32.totalorder %v1017_v11, %v664_v32 }
  0x42   :  { %542 = vst [vmem:[#allocation5 + $0x20] sm:$0xf] %v908_v20  ;;  %543 = vst [vmem:[#allocation5 + $0x24] sm:$0xf] %v909_v21  ;;  %v572_v37 = vsel %vm571_vm11, %v1043_v28, %v553_v12  ;;  %v601_v38 = vsel %vm599_vm0, 65537, %v958_v17  ;;  %v792_v39 = vld [vmem:[#allocation5 + $0x18] sm:$0xff]   ;;  %vm666_vm10 = vcmp.eq.s32.totalorder %v1033_v23, %v664_v32  ;;  %v626_v45 = vsel %vm1048_vm4, %v1035_v24, %v940_v36 }
  0x43   :  { %vm637_vm3 = vmpackc.low %vm631_vm1, %vm631_vm1  ;;  %vm1326_vm8 = vcmp.ne.s16.totalorder %v913_v34, 0  ;;  %v914_v41 = vcombine.low %v600_v35, %v601_v38  ;;  %793 = vst [vmem:[%s1395_s4 + $0x30] sm:$0xff] %v792_v39   ;;  %v703_v50 = vstv %s702_s17  ;;  %v720_v51 = vstv %s719_s18 }
  0x44   :  { %vm638_vm9 = vmpackc.low %vm632_vm2, %vm632_vm2  ;;  %v639_v42 = vsel %vm637_vm3, 65537, %v958_v17  ;;  %v589_v43 = vsel %vm1326_vm8, %v1046_v29, %v572_v37  ;;  %vm704_vm1 = vcmp.eq.s32.totalorder %v1017_v11, %v703_v50  ;;  %vm705_vm3 = vcmp.eq.s32.totalorder %v1033_v23, %v703_v50 }
  0x45   :  { %v640_v44 = vsel %vm638_vm9, 65537, %v958_v17  ;;  %vm654_vm6 = vmpackc.low %vm648_vm14, %vm648_vm14  ;;  %vm605_vm13 = vcmp.ne.s16.totalorder %v914_v41, 0  ;;  %vm721_vm8 = vcmp.eq.s32.totalorder %v1017_v11, %v720_v51  ;;  %v737_v0 = vstv %s736_s21 }
  0x46   :  { %v919_v46 = vcombine.low %v639_v42, %v640_v44  ;;  %vm655_vm15 = vmpackc.low %vm649_vm5, %vm649_vm5  ;;  %v656_v47 = vsel %vm654_vm6, 65537, %v958_v17  ;;  %v606_v48 = vsel %vm605_vm13, %v1053_v33, %v589_v43  ;;  %vm722_vm5 = vcmp.eq.s32.totalorder %v1033_v23, %v720_v51 }
  0x47   :  { %v657_v49 = vsel %vm655_vm15, 65537, %v958_v17  ;;  %vm671_vm7 = vmpackc.low %vm665_vm12, %vm665_vm12  ;;  %v915_v52 = vcombine.low %v606_v48, %v606_v48  ;;  %v916_v53 = vcombine.high %v606_v48, %v606_v48  ;;  %vm739_vm13 = vcmp.eq.s32.totalorder %v1033_v23, %v737_v0 }
  0x48   :  { %vm644_vm11 = vcmp.ne.s16.totalorder %v919_v46, 0  ;;  %v920_v54 = vcombine.low %v656_v47, %v657_v49  ;;  %vm672_vm0 = vmpackc.low %vm666_vm10, %vm666_vm10  ;;  %v673_v56 = vsel %vm671_vm7, 65537, %v958_v17  ;;  %vm738_vm10 = vcmp.eq.s32.totalorder %v1017_v11, %v737_v0 }
  0x49   :  { %v645_v55 = vsel %vm644_vm11, %v1043_v28, %v626_v45  ;;  %v674_v57 = vsel %vm672_vm0, 65537, %v958_v17  ;;  %v796_v59 = vld [vmem:[#allocation5 + $0x20] sm:$0xff]   ;;  %615 = vst [vmem:[#allocation5 + $0x28] sm:$0xf] %v915_v52  ;;  %616 = vst [vmem:[#allocation5 + $0x2c] sm:$0xf] %v916_v53  ;;  %v699_v3 = vsel %vm1048_vm4, %v1035_v24, %v941_v58 }
  0x4a   :  { %vm1354_vm2 = vcmp.ne.s16.totalorder %v920_v54, 0  ;;  %v921_v61 = vcombine.low %v673_v56, %v674_v57  ;;  %vm710_vm14 = vmpackc.low %vm704_vm1, %vm704_vm1  ;;  %797 = vst [vmem:[%s1395_s4 + $0x40] sm:$0xff] %v796_v59  }
  0x4b   :  { %v662_v62 = vsel %vm1354_vm2, %v1046_v29, %v645_v55  ;;  %vm711_vm9 = vmpackc.low %vm705_vm3, %vm705_vm3  ;;  %v712_v63 = vsel %vm710_vm14, 65537, %v958_v17 }
  0x4c   :  { %vm678_vm6 = vcmp.ne.s16.totalorder %v921_v61, 0  ;;  %v713_v1 = vsel %vm711_vm9, 65537, %v958_v17  ;;  %vm727_vm12 = vmpackc.low %vm721_vm8, %vm721_vm8 }
  0x4d   :  { %v679_v2 = vsel %vm678_vm6, %v1053_v33, %v662_v62  ;;  %v926_v4 = vcombine.low %v712_v63, %v713_v1  ;;  %vm728_vm15 = vmpackc.low %vm722_vm5, %vm722_vm5  ;;  %v729_v5 = vsel %vm727_vm12, 65537, %v958_v17 }
  0x4e   :  { %v922_v6 = vcombine.low %v679_v2, %v679_v2  ;;  %v923_v7 = vcombine.high %v679_v2, %v679_v2  ;;  %v730_v8 = vsel %vm728_vm15, 65537, %v958_v17  ;;  %vm744_vm7 = vmpackc.low %vm738_vm10, %vm738_vm10 }
  0x4f   :  { %vm717_vm11 = vcmp.ne.s16.totalorder %v926_v4, 0  ;;  %v927_v9 = vcombine.low %v729_v5, %v730_v8  ;;  %vm745_vm0 = vmpackc.low %vm739_vm13, %vm739_vm13  ;;  %v746_v11 = vsel %vm744_vm7, 65537, %v958_v17 }
  0x50   :  { %688 = vst [vmem:[#allocation5 + $0x30] sm:$0xf] %v922_v6  ;;  %689 = vst [vmem:[#allocation5 + $0x34] sm:$0xf] %v923_v7  ;;  %v718_v23 = vsel %vm717_vm11, %v1043_v28, %v699_v3  ;;  %v747_v24 = vsel %vm745_vm0, 65537, %v958_v17  ;;  %v800_v10 = vld [vmem:[#allocation5 + $0x28] sm:$0xff]  }
  0x51   :  { %vm734_vm4 = vcmp.ne.s16.totalorder %v927_v9, 0  ;;  %v928_v30 = vcombine.low %v746_v11, %v747_v24  ;;  %801 = vst [vmem:[%s1395_s4 + $0x50] sm:$0xff] %v800_v10  }
  0x52   :  { %v735_v12 = vsel %vm734_vm4, %v1046_v29, %v718_v23 }
  0x53   :  { %vm751_vm1 = vcmp.ne.s16.totalorder %v928_v30, 0 }
  0x54   :  { %v752_v13 = vsel %vm751_vm1, %v1053_v33, %v735_v12 }
  0x55   :  { %v929_v14 = vcombine.low %v752_v13, %v752_v13  ;;  %v930_v15 = vcombine.high %v752_v13, %v752_v13 }
  0x57   :  { %761 = vst [vmem:[#allocation5 + $0x38] sm:$0xf] %v929_v14  ;;  %762 = vst [vmem:[#allocation5 + $0x3c] sm:$0xf] %v930_v15  ;;  %v804_v16 = vld [vmem:[#allocation5 + $0x30] sm:$0xff]  }
  0x58   :  { %805 = vst [vmem:[%s1395_s4 + $0x60] sm:$0xff] %v804_v16  }
  0x5e   :  { %v808_v17 = vld [vmem:[#allocation5 + $0x38] sm:$0xff]  }
  0x5f   :  { %809 = vst [vmem:[%s1395_s4 + $0x70] sm:$0xff] %v808_v17  }
  0x60   :  { %866 = vsyncpa [#allocation4], 1 }

</bundles_post_ra>
